<compile_context>
chip_gen: v5e
topology: v5e:2x2
jax: 0.10.0
libtpu: 0.0.40
codegen_flags: <defaults>
</compile_context>

<pallas_src>
import functools

import jax
import jax.numpy as jnp
from jax import lax
from jax.experimental import pallas as pl
from jax.experimental.pallas import tpu as pltpu


def _round_up(x, m):
    return (x + m - 1) // m * m


def _default_group():
    """MXU-width packing factor: 8 groups of N=32 for 256-wide MXUs (v6e/v7x),
    4 groups for 128-wide MXUs (v2-v5)."""
    try:
        kind = jax.devices()[0].device_kind.lower()
    except Exception:
        return 8
    if any(t in kind for t in ("v2", "v3", "v4", "v5")):
        return 4
    return 8


def mlp_kernel(num_layers, n, g, x_ref, w0a_ref, w0b_ref, b0_ref, wh_ref,
               bh_ref, wl_ref, bl_ref, o_ref):
    """Grouped, transposed activations: sublanes = g*N + n, lanes = batch.

    x_ref : [2, G, TBG]    per-feature, per-group input lanes
    w0a/w0b/b0 : [1, N, 1] first-layer params (f32, VPU path)
    wh_ref: [L, G*N, G*N]  block-diag hidden weights (MXU dtype, L=max(layers,1))
    bh_ref: [L, G*N, 1]    group-tiled hidden biases (f32)
    wl_ref: [G*N, 1]       group-tiled final-layer column (f32, VPU path)
    bl_ref: [1, 1]
    o_ref : [G, TBG]       lane-dense output block
    """
    tbg = x_ref.shape[2]
    x0 = x_ref[0]                                   # [G, TBG] feature 0
    x1 = x_ref[1]                                   # [G, TBG] feature 1
    # Layer 0 (fan-in 2): VPU broadcast multiply-add, no MXU pushes.
    h = (w0a_ref[...] * x0[:, None, :] + w0b_ref[...] * x1[:, None, :]
         + b0_ref[...])                             # [G, N, TBG]
    h = jnp.maximum(h.reshape(g * n, tbg), 0.0)     # [G*N, TBG] f32
    # Hidden layers: one block-diagonal [G*N, G*N] matmul each; MXU runs at
    # native width, bf16 operands, f32 accumulation; bias/ReLU in f32.
    for l in range(num_layers):
        z = jnp.dot(wh_ref[l], h.astype(wh_ref.dtype),
                    preferred_element_type=jnp.float32)
        h = jnp.maximum(z + bh_ref[l], 0.0)
    # Final layer (fan-out 1): VPU multiply + per-group sublane reduction.
    prod = wl_ref[...] * h                          # [G*N, TBG]
    y = jnp.sum(prod.reshape(g, n, tbg), axis=1)    # [G, TBG]
    o_ref[...] = y + bl_ref[...]


def prepare_params(params, num_layers, group=None, mxu_dtype=jnp.bfloat16):
    """One-time layout prep (do NOT call per forward).

    Builds group-packed kernel parameters:
      * hidden weights: [L, G*N, G*N] block-diagonal kron(I_G, W.T), mxu_dtype
      * hidden biases : [L, G*N, 1] group-tiled, f32
      * first layer   : [1, N, 1] columns / bias, f32 (VPU path)
      * final layer   : [G*N, 1] group-tiled column, f32 (VPU path)
    """
    w0, b0, wh, bh, wl, bl = params
    if group is None:
        group = _default_group()
    g = int(group)
    n = w0.shape[1]
    L = max(num_layers, 1)   # keep a non-empty stacked tensor even if 0 layers

    w0f = jnp.asarray(w0, jnp.float32)          # [2, N] (in, out)
    w0a = w0f[0].reshape(1, n, 1)
    w0b = w0f[1].reshape(1, n, 1)
    b0c = jnp.asarray(b0, jnp.float32).reshape(1, n, 1)

    whg = jnp.zeros((L, g * n, g * n), jnp.float32)
    bhg = jnp.zeros((L, g * n, 1), jnp.float32)
    if num_layers > 0:
        wk = jnp.transpose(jnp.asarray(wh, jnp.float32), (0, 2, 1))  # [L,out,in]
        eye_g = jnp.eye(g, dtype=jnp.float32)
        blockdiag = jnp.einsum("gh,lab->lgahb", eye_g, wk).reshape(
            num_layers, g * n, g * n)                                # kron(I_G, Wk)
        whg = whg.at[:num_layers].set(blockdiag)
        bhg = bhg.at[:num_layers].set(
            jnp.tile(jnp.asarray(bh, jnp.float32), (1, g))[..., None])
    whg = whg.astype(mxu_dtype)

    wlg = jnp.tile(jnp.asarray(wl, jnp.float32).reshape(n), (g,)).reshape(g * n, 1)
    blk = jnp.asarray(bl, jnp.float32).reshape(1, 1)
    return w0a, w0b, b0c, whg, bhg, wlg, blk


def simple_neural_net_forward(x, kparams, num_layers, tile_lanes=4096):
    """x: [B, 2]. kparams from prepare_params(). Returns [B, 1] float32."""
    w0a, w0b, b0c, whg, bhg, wlg, blk = kparams
    B, d_in = x.shape
    assert d_in == 2
    n = w0a.shape[1]
    gn = whg.shape[1]
    g = gn // n
    L = whg.shape[0]

    # Lane tiling: each of the G groups carries `lanes` (>=128, multiple of
    # 128) batch lanes.  Use a large tile (amortize per-grid-step overhead)
    # but keep >= 2 grid tiles where possible (v7x megacore sharding).
    lanes = _round_up(pl.cdiv(B, g), 128)
    tbg = min(tile_lanes, lanes)
    if lanes >= 256:
        tbg = min(tbg, _round_up(pl.cdiv(lanes, 2), 128))
    num_tiles = pl.cdiv(lanes, tbg)
    lg = num_tiles * tbg
    bp = g * lg

    # Single per-call prep pass over x: pad the batch, transpose to
    # feature-major, fold into G contiguous groups (the reshape is free).
    xt = jnp.zeros((2, bp), jnp.float32).at[:, :B].set(x.astype(jnp.float32).T)
    xg = xt.reshape(2, g, lg)

    kern = functools.partial(mlp_kernel, num_layers, n, g)
    const2 = lambda i: (0, 0)
    const3 = lambda i: (0, 0, 0)

    flops = 2 * B * n * (2 + num_layers * n + 1)
    bytes_accessed = int(4 * 3 * bp + whg.size * whg.dtype.itemsize
                         + 4 * (3 * n + 2 * L * gn + gn + 1))

    out = pl.pallas_call(
        kern,
        out_shape=jax.ShapeDtypeStruct((g, lg), jnp.float32),
        grid=(num_tiles,),
        in_specs=[
            pl.BlockSpec((2, g, tbg), lambda i: (0, 0, i)),  # x: streamed per tile
            pl.BlockSpec((1, n, 1), const3),                 # params: VMEM-resident
            pl.BlockSpec((1, n, 1), const3),
            pl.BlockSpec((1, n, 1), const3),
            pl.BlockSpec((L, gn, gn), const3),
            pl.BlockSpec((L, gn, 1), const3),
            pl.BlockSpec((gn, 1), const2),
            pl.BlockSpec((1, 1), const2),
        ],
        out_specs=pl.BlockSpec((g, tbg), lambda i: (0, i)),
        compiler_params=pltpu.CompilerParams(
            dimension_semantics=("parallel",),
            vmem_limit_bytes=48 * 1024 * 1024),
        cost_estimate=pl.CostEstimate(
            flops=flops, transcendentals=0, bytes_accessed=bytes_accessed),
    )(xg, w0a, w0b, b0c, whg, bhg, wlg, blk)

    # out[g, j] is the prediction for batch element g*Lg + j.
    return out.reshape(bp)[:B].reshape(B, 1)


def init_params(key, neurons_per_layer, num_layers):
    """Deterministic init mimicking nn.Linear (uniform +-1/sqrt(fan_in)).
    Weights are stored as [in_features, out_features] (torch W.T)."""
    def linear(k, fan_in, fan_out):
        kw, kb = jax.random.split(k)
        bound = 1.0 / jnp.sqrt(fan_in)
        w = jax.random.uniform(kw, (fan_in, fan_out), jnp.float32, -bound, bound)
        b = jax.random.uniform(kb, (fan_out,), jnp.float32, -bound, bound)
        return w, b

    keys = jax.random.split(key, num_layers + 2)
    w0, b0 = linear(keys[0], 2, neurons_per_layer)
    wh_list, bh_list = [], []
    for i in range(num_layers):
        w, b = linear(keys[1 + i], neurons_per_layer, neurons_per_layer)
        wh_list.append(w)
        bh_list.append(b)
    if num_layers > 0:
        wh = jnp.stack(wh_list)           # [L, N, N]
        bh = jnp.stack(bh_list)           # [L, N]
    else:
        wh = jnp.zeros((0, neurons_per_layer, neurons_per_layer), jnp.float32)
        bh = jnp.zeros((0, neurons_per_layer), jnp.float32)
    wl, bl = linear(keys[-1], neurons_per_layer, 1)
    return w0, b0, wh, bh, wl, bl


def reference_forward(x, params, num_layers):
    w0, b0, wh, bh, wl, bl = params
    hp = lax.Precision.HIGHEST
    h = jnp.maximum(jnp.dot(x, w0, precision=hp) + b0, 0.0)
    for l in range(num_layers):
        h = jnp.maximum(jnp.dot(h, wh[l], precision=hp) + bh[l], 0.0)
    return jnp.dot(h, wl, precision=hp) + bl


if __name__ == "__main__":
    NEURONS_PER_LAYER = 32
    NUM_LAYERS = 2
    BATCH = 8

    key = jax.random.PRNGKey(0)
    k_params, k_x = jax.random.split(key)
    params = init_params(k_params, NEURONS_PER_LAYER, NUM_LAYERS)
    x = jax.random.normal(k_x, (BATCH, 2), jnp.float32)

    fwd = jax.jit(functools.partial(simple_neural_net_forward,
                                    num_layers=NUM_LAYERS))

    # Performance path: bf16 MXU operands, f32 accumulation.
    kparams_bf16 = prepare_params(params, NUM_LAYERS)
    y = jax.block_until_ready(fwd(x, kparams_bf16))

    # Exact path (f32 MXU operands) for a tight correctness check.
    kparams_f32 = prepare_params(params, NUM_LAYERS, mxu_dtype=jnp.float32)
    y_f32 = jax.block_until_ready(fwd(x, kparams_f32))

    y_ref = reference_forward(x, params, NUM_LAYERS)
    assert y.shape == (BATCH, 1)
    assert jnp.allclose(y_f32, y_ref, atol=1e-3, rtol=1e-3)
    assert jnp.allclose(y, y_ref, atol=1e-1, rtol=1e-1)

    print("KERNEL_OK")
</pallas_src>

<mosaic_0001>
module attributes {stable_mosaic.version = 11 : i64} {
  func.func @mlp_kernel(%arg0: i32, %arg1: memref<2x8x128xf32, #tpu.memory_space<vmem>>, %arg2: memref<1x32x1xf32, #tpu.memory_space<vmem>>, %arg3: memref<1x32x1xf32, #tpu.memory_space<vmem>>, %arg4: memref<1x32x1xf32, #tpu.memory_space<vmem>>, %arg5: memref<2x256x256xbf16, #tpu.memory_space<vmem>>, %arg6: memref<2x256x1xf32, #tpu.memory_space<vmem>>, %arg7: memref<256x1xf32, #tpu.memory_space<vmem>>, %arg8: memref<1x1xf32, #tpu.memory_space<vmem>>, %arg9: memref<8x128xf32, #tpu.memory_space<vmem>>) attributes {dimension_semantics = [#tpu.dimension_semantics<parallel>], iteration_bounds = array<i64: 1>, scalar_prefetch = 0 : i64, scratch_operands = 0 : i64, tpu.core_type = #tpu.core_type<tc>, window_params = [{transform_indices = @transform_0, window_bounds = array<i64: 2, 8, 128>}, {pipeline_mode = #tpu.pipeline_mode<synchronous>, transform_indices = @transform_1, window_bounds = array<i64: 1, 32, 1>}, {pipeline_mode = #tpu.pipeline_mode<synchronous>, transform_indices = @transform_2, window_bounds = array<i64: 1, 32, 1>}, {pipeline_mode = #tpu.pipeline_mode<synchronous>, transform_indices = @transform_3, window_bounds = array<i64: 1, 32, 1>}, {pipeline_mode = #tpu.pipeline_mode<synchronous>, transform_indices = @transform_4, window_bounds = array<i64: 2, 256, 256>}, {pipeline_mode = #tpu.pipeline_mode<synchronous>, transform_indices = @transform_5, window_bounds = array<i64: 2, 256, 1>}, {pipeline_mode = #tpu.pipeline_mode<synchronous>, transform_indices = @transform_6, window_bounds = array<i64: 256, 1>}, {pipeline_mode = #tpu.pipeline_mode<synchronous>, transform_indices = @transform_7, window_bounds = array<i64: 1, 1>}, {transform_indices = @transform_8, window_bounds = array<i64: 8, 128>}]} {
    %c0 = arith.constant 0 : index
    %c0_0 = arith.constant 0 : index
    %c0_1 = arith.constant 0 : index
    %0 = vector.load %arg1[%c0, %c0_0, %c0_1] : memref<2x8x128xf32, #tpu.memory_space<vmem>>, vector<1x8x128xf32>
    %1 = vector.shape_cast %0 : vector<1x8x128xf32> to vector<8x128xf32>
    %c1 = arith.constant 1 : index
    %c0_2 = arith.constant 0 : index
    %c0_3 = arith.constant 0 : index
    %2 = vector.load %arg1[%c1, %c0_2, %c0_3] : memref<2x8x128xf32, #tpu.memory_space<vmem>>, vector<1x8x128xf32>
    %3 = vector.shape_cast %2 : vector<1x8x128xf32> to vector<8x128xf32>
    %c0_4 = arith.constant 0 : index
    %c0_5 = arith.constant 0 : index
    %c0_6 = arith.constant 0 : index
    %4 = vector.load %arg2[%c0_4, %c0_5, %c0_6] : memref<1x32x1xf32, #tpu.memory_space<vmem>>, vector<1x32x1xf32>
    %5 = vector.shape_cast %1 : vector<8x128xf32> to vector<8x1x128xf32>
    %6 = vector.broadcast %4 : vector<1x32x1xf32> to vector<8x32x128xf32>
    %7 = vector.broadcast %5 : vector<8x1x128xf32> to vector<8x32x128xf32>
    %8 = arith.mulf %6, %7 : vector<8x32x128xf32>
    %c0_7 = arith.constant 0 : index
    %c0_8 = arith.constant 0 : index
    %c0_9 = arith.constant 0 : index
    %9 = vector.load %arg3[%c0_7, %c0_8, %c0_9] : memref<1x32x1xf32, #tpu.memory_space<vmem>>, vector<1x32x1xf32>
    %10 = vector.shape_cast %3 : vector<8x128xf32> to vector<8x1x128xf32>
    %11 = vector.broadcast %9 : vector<1x32x1xf32> to vector<8x32x128xf32>
    %12 = vector.broadcast %10 : vector<8x1x128xf32> to vector<8x32x128xf32>
    %13 = arith.mulf %11, %12 : vector<8x32x128xf32>
    %14 = arith.addf %8, %13 : vector<8x32x128xf32>
    %c0_10 = arith.constant 0 : index
    %c0_11 = arith.constant 0 : index
    %c0_12 = arith.constant 0 : index
    %15 = vector.load %arg4[%c0_10, %c0_11, %c0_12] : memref<1x32x1xf32, #tpu.memory_space<vmem>>, vector<1x32x1xf32>
    %16 = vector.broadcast %15 : vector<1x32x1xf32> to vector<8x32x128xf32>
    %17 = arith.addf %14, %16 : vector<8x32x128xf32>
    %18 = vector.shape_cast %17 : vector<8x32x128xf32> to vector<256x128xf32>
    %cst = arith.constant 0.000000e+00 : f32
    %19 = vector.broadcast %cst : f32 to vector<256x128xf32>
    %20 = arith.maximumf %18, %19 : vector<256x128xf32>
    %c0_13 = arith.constant 0 : index
    %c0_14 = arith.constant 0 : index
    %c0_15 = arith.constant 0 : index
    %21 = vector.load %arg5[%c0_13, %c0_14, %c0_15] : memref<2x256x256xbf16, #tpu.memory_space<vmem>>, vector<1x256x256xbf16>
    %22 = vector.shape_cast %21 : vector<1x256x256xbf16> to vector<256x256xbf16>
    %23 = arith.truncf %20 : vector<256x128xf32> to vector<256x128xbf16>
    %cst_16 = arith.constant dense<0.000000e+00> : vector<256x128xf32>
    %24 = tpu.matmul %22, %23, %cst_16 {dimension_numbers = #tpu.dot_dimension_numbers<[1], [0], [0], [1], [0, 0, 1, 1], [], []>} : vector<256x256xbf16>, vector<256x128xbf16>, vector<256x128xf32> -> vector<256x128xf32>
    %c0_17 = arith.constant 0 : index
    %c0_18 = arith.constant 0 : index
    %c0_19 = arith.constant 0 : index
    %25 = vector.load %arg6[%c0_17, %c0_18, %c0_19] : memref<2x256x1xf32, #tpu.memory_space<vmem>>, vector<1x256x1xf32>
    %26 = vector.shape_cast %25 : vector<1x256x1xf32> to vector<256x1xf32>
    %27 = vector.broadcast %26 : vector<256x1xf32> to vector<256x128xf32>
    %28 = arith.addf %24, %27 : vector<256x128xf32>
    %cst_20 = arith.constant 0.000000e+00 : f32
    %29 = vector.broadcast %cst_20 : f32 to vector<256x128xf32>
    %30 = arith.maximumf %28, %29 : vector<256x128xf32>
    %c1_21 = arith.constant 1 : index
    %c0_22 = arith.constant 0 : index
    %c0_23 = arith.constant 0 : index
    %31 = vector.load %arg5[%c1_21, %c0_22, %c0_23] : memref<2x256x256xbf16, #tpu.memory_space<vmem>>, vector<1x256x256xbf16>
    %32 = vector.shape_cast %31 : vector<1x256x256xbf16> to vector<256x256xbf16>
    %33 = arith.truncf %30 : vector<256x128xf32> to vector<256x128xbf16>
    %cst_24 = arith.constant dense<0.000000e+00> : vector<256x128xf32>
    %34 = tpu.matmul %32, %33, %cst_24 {dimension_numbers = #tpu.dot_dimension_numbers<[1], [0], [0], [1], [0, 0, 1, 1], [], []>} : vector<256x256xbf16>, vector<256x128xbf16>, vector<256x128xf32> -> vector<256x128xf32>
    %c1_25 = arith.constant 1 : index
    %c0_26 = arith.constant 0 : index
    %c0_27 = arith.constant 0 : index
    %35 = vector.load %arg6[%c1_25, %c0_26, %c0_27] : memref<2x256x1xf32, #tpu.memory_space<vmem>>, vector<1x256x1xf32>
    %36 = vector.shape_cast %35 : vector<1x256x1xf32> to vector<256x1xf32>
    %37 = vector.broadcast %36 : vector<256x1xf32> to vector<256x128xf32>
    %38 = arith.addf %34, %37 : vector<256x128xf32>
    %cst_28 = arith.constant 0.000000e+00 : f32
    %39 = vector.broadcast %cst_28 : f32 to vector<256x128xf32>
    %40 = arith.maximumf %38, %39 : vector<256x128xf32>
    %c0_29 = arith.constant 0 : index
    %c0_30 = arith.constant 0 : index
    %41 = vector.load %arg7[%c0_29, %c0_30] : memref<256x1xf32, #tpu.memory_space<vmem>>, vector<256x1xf32>
    %42 = vector.broadcast %41 : vector<256x1xf32> to vector<256x128xf32>
    %43 = arith.mulf %42, %40 : vector<256x128xf32>
    %44 = vector.shape_cast %43 : vector<256x128xf32> to vector<8x32x128xf32>
    %cst_31 = arith.constant dense<0.000000e+00> : vector<8x128xf32>
    %45 = vector.multi_reduction <add>, %44, %cst_31 [1] : vector<8x32x128xf32> to vector<8x128xf32>
    %c0_32 = arith.constant 0 : index
    %c0_33 = arith.constant 0 : index
    %46 = vector.load %arg8[%c0_32, %c0_33] : memref<1x1xf32, #tpu.memory_space<vmem>>, vector<1x1xf32>
    %47 = vector.broadcast %46 : vector<1x1xf32> to vector<8x128xf32>
    %48 = arith.addf %45, %47 : vector<8x128xf32>
    %c0_34 = arith.constant 0 : index
    %c0_35 = arith.constant 0 : index
    %49 = vector.load %arg9[%c0_34, %c0_35] : memref<8x128xf32, #tpu.memory_space<vmem>>, vector<8x128xf32>
    tpu.vector_store %arg9[%c0_34, %c0_35], %48 {strides = array<i32>} : memref<8x128xf32, #tpu.memory_space<vmem>>, vector<8x128xf32>,
    return
  }
  func.func @transform_0(%arg0: i32) -> (i32, i32, i32) {
    %c0_i32 = arith.constant 0 : i32
    %c0_i32_0 = arith.constant 0 : i32
    %c0_i32_1 = arith.constant 0 : i32
    return %c0_i32, %c0_i32_0, %arg0 : i32, i32, i32
  }
  func.func @transform_1(%arg0: i32) -> (i32, i32, i32) {
    %c0_i32 = arith.constant 0 : i32
    %c0_i32_0 = arith.constant 0 : i32
    %c0_i32_1 = arith.constant 0 : i32
    %c0_i32_2 = arith.constant 0 : i32
    return %c0_i32, %c0_i32_0, %c0_i32_1 : i32, i32, i32
  }
  func.func @transform_2(%arg0: i32) -> (i32, i32, i32) {
    %c0_i32 = arith.constant 0 : i32
    %c0_i32_0 = arith.constant 0 : i32
    %c0_i32_1 = arith.constant 0 : i32
    %c0_i32_2 = arith.constant 0 : i32
    return %c0_i32, %c0_i32_0, %c0_i32_1 : i32, i32, i32
  }
  func.func @transform_3(%arg0: i32) -> (i32, i32, i32) {
    %c0_i32 = arith.constant 0 : i32
    %c0_i32_0 = arith.constant 0 : i32
    %c0_i32_1 = arith.constant 0 : i32
    %c0_i32_2 = arith.constant 0 : i32
    return %c0_i32, %c0_i32_0, %c0_i32_1 : i32, i32, i32
  }
  func.func @transform_4(%arg0: i32) -> (i32, i32, i32) {
    %c0_i32 = arith.constant 0 : i32
    %c0_i32_0 = arith.constant 0 : i32
    %c0_i32_1 = arith.constant 0 : i32
    %c0_i32_2 = arith.constant 0 : i32
    return %c0_i32, %c0_i32_0, %c0_i32_1 : i32, i32, i32
  }
  func.func @transform_5(%arg0: i32) -> (i32, i32, i32) {
    %c0_i32 = arith.constant 0 : i32
    %c0_i32_0 = arith.constant 0 : i32
    %c0_i32_1 = arith.constant 0 : i32
    %c0_i32_2 = arith.constant 0 : i32
    return %c0_i32, %c0_i32_0, %c0_i32_1 : i32, i32, i32
  }
  func.func @transform_6(%arg0: i32) -> (i32, i32) {
    %c0_i32 = arith.constant 0 : i32
    %c0_i32_0 = arith.constant 0 : i32
    %c0_i32_1 = arith.constant 0 : i32
    return %c0_i32, %c0_i32_0 : i32, i32
  }
  func.func @transform_7(%arg0: i32) -> (i32, i32) {
    %c0_i32 = arith.constant 0 : i32
    %c0_i32_0 = arith.constant 0 : i32
    %c0_i32_1 = arith.constant 0 : i32
    return %c0_i32, %c0_i32_0 : i32, i32
  }
  func.func @transform_8(%arg0: i32) -> (i32, i32) {
    %c0_i32 = arith.constant 0 : i32
    %c0_i32_0 = arith.constant 0 : i32
    return %c0_i32, %arg0 : i32, i32
  }
}

</mosaic_0001>

<bundles_post_ra>
// kernel: simple_neural_net_forward.1
= control target key start
LH: loop header
LB: loop body
LE: loop exit
PB: predicated region body
PF: predicated region fallthrough
CT: control target
= control target key end

     0   :  { %v2265_v0 = vmov 0   ;;  %vm1855_vm0 = vcmask 1041409   ;;  %vm1857_vm1 = vcmask 1042434   ;;  %vm1859_vm2 = vcmask 1043459   ;;  %s3562_s2 = inlined_call_operand.vmem [shape: f32[1,32,1], index: 2, kind: input, shape index: {}]   ;;  %s3563_s1 = inlined_call_operand.vmem [shape: f32[1,32,1], index: 1, kind: input, shape index: {}]   ;;  %s3564_s3 = inlined_call_operand.vmem [shape: f32[1,32,1], index: 3, kind: input, shape index: {}]   ;;  %s3565_s5 = inlined_call_operand.vmem [shape: f32[2,256,1], index: 5, kind: input, shape index: {}]   ;;  %s3566_s0 = inlined_call_operand.vmem [shape: f32[2,8,128], index: 0, kind: input, shape index: {}]   ;;  %s3567_s4 = inlined_call_operand.vmem [shape: bf16[2,256,256], index: 4, kind: input, shape index: {}]   ;;  %s3568_s6 = inlined_call_operand.vmem [shape: f32[256,1], index: 6, kind: input, shape index: {}]   ;;  %s3569_s7 = inlined_call_operand.<no memory space> [shape: f32[1,1], index: 7, kind: input, shape index: {}]   ;;  %s3570_s8 = inlined_call_operand.vmem [shape: f32[8,128], index: 8, kind: output, shape index: {}]  }
   0x1   :  { %2263 = vset.pattern.permute.xlu2 %v2265_v0  ;;  %2262 = vset.pattern.permute.xlu1 %v2265_v0  ;;  %v116_v1 = vld [vmem:[%s3562_s2 + $0x10] sm:$0xff]  ;;  %v34_v3 = vld [vmem:[%s3563_s1] sm:$0xff]  ;;  %v117_v4 = vld [vmem:[%s3562_s2 + $0x18] sm:$0xff]  ;;  %vm1861_vm3 = vcmask 1044484   ;;  %vm1863_vm4 = vcmask 1045509   ;;  %vm1865_vm5 = vcmask 1046534  }
   0x2   :  { %v36_v2 = vld [vmem:[%s3563_s1 + $0x10] sm:$0xff]  ;;  %2261 = vset.pattern.permute.xlu0 %v2265_v0  ;;  %138 = vperm.xlu1 %2262, %v116_v1   ;;  %v37_v5 = vld [vmem:[%s3563_s1 + $0x18] sm:$0xff]  ;;  %v35_v6 = vld [vmem:[%s3563_s1 + $0x8] sm:$0xff]  ;;  %vm1867_vm6 = vcmask 1047559  }
   0x3   :  { %58 = vperm.xlu0 %2261, %v36_v2   ;;  %48 = vperm.xlu2 %2263, %v34_v3   ;;  %v115_v7 = vld [vmem:[%s3562_s2 + $0x8] sm:$0xff]  ;;  %v114_v8 = vld [vmem:[%s3562_s2] sm:$0xff]  ;;  %v228_v9 = vld [vmem:[%s3564_s3 + $0x10] sm:$0xff] }
   0x4   :  { %v226_v10 = vld [vmem:[%s3564_s3] sm:$0xff]  ;;  %v229_v11 = vld [vmem:[%s3564_s3 + $0x18] sm:$0xff]  ;;  %v227_v12 = vld [vmem:[%s3564_s3 + $0x8] sm:$0xff] }
   0x5   :  { %v363_v13 = vld [vmem:[%s3565_s5 + $0x8] sm:$0xff]  ;;  %v362_v14 = vld [vmem:[%s3565_s5] sm:$0xff]  ;;  %v364_v15 = vld [vmem:[%s3565_s5 + $0x10] sm:$0xff] }
   0x6   :  { %v366_v16 = vld [vmem:[%s3565_s5 + $0x20] sm:$0xff]  ;;  %v365_v17 = vld [vmem:[%s3565_s5 + $0x18] sm:$0xff]  ;;  %v367_v18 = vld [vmem:[%s3565_s5 + $0x28] sm:$0xff] }
   0x7   :  { %v369_v19 = vld [vmem:[%s3565_s5 + $0x38] sm:$0xff]  ;;  %v368_v20 = vld [vmem:[%s3565_s5 + $0x30] sm:$0xff]  ;;  %v370_v21 = vld [vmem:[%s3565_s5 + $0x40] sm:$0xff] }
   0x8   :  { %v372_v22 = vld [vmem:[%s3565_s5 + $0x50] sm:$0xff]  ;;  %v371_v23 = vld [vmem:[%s3565_s5 + $0x48] sm:$0xff]  ;;  %v373_v24 = vld [vmem:[%s3565_s5 + $0x58] sm:$0xff] }
   0x9   :  { %v375_v25 = vld [vmem:[%s3565_s5 + $0x68] sm:$0xff]  ;;  %v374_v26 = vld [vmem:[%s3565_s5 + $0x60] sm:$0xff]  ;;  %v376_v27 = vld [vmem:[%s3565_s5 + $0x70] sm:$0xff] }
   0xa   :  { %143 = vperm.xlu1 %2262, %v117_v4   ;;  %v378_v28 = vld [vmem:[%s3565_s5 + $0x80] sm:$0xff]  ;;  %v377_v29 = vld [vmem:[%s3565_s5 + $0x78] sm:$0xff]  ;;  %v392_v30 = vld [vmem:[%s3565_s5 + $0xf0] sm:$0xff] }
   0xb   :  { %63 = vperm.xlu0 %2261, %v37_v5   ;;  %53 = vperm.xlu2 %2263, %v35_v6   ;;  %v390_v31 = vld [vmem:[%s3565_s5 + $0xe0] sm:$0xff]  ;;  %v393_v32 = vld [vmem:[%s3565_s5 + $0xf8] sm:$0xff]  ;;  %v391_v33 = vld [vmem:[%s3565_s5 + $0xe8] sm:$0xff] }
   0xc   :  { %v389_v34 = vld [vmem:[%s3565_s5 + $0xd8] sm:$0xff]  ;;  %v388_v35 = vld [vmem:[%s3565_s5 + $0xd0] sm:$0xff]  ;;  %v386_v36 = vld [vmem:[%s3565_s5 + $0xc0] sm:$0xff] }
   0xd   :  { %v384_v37 = vld [vmem:[%s3565_s5 + $0xb0] sm:$0xff]  ;;  %v387_v38 = vld [vmem:[%s3565_s5 + $0xc8] sm:$0xff]  ;;  %v385_v39 = vld [vmem:[%s3565_s5 + $0xb8] sm:$0xff] }
   0xe   :  { %v383_v40 = vld [vmem:[%s3565_s5 + $0xa8] sm:$0xff]  ;;  %v382_v41 = vld [vmem:[%s3565_s5 + $0xa0] sm:$0xff]  ;;  %v380_v42 = vld [vmem:[%s3565_s5 + $0x90] sm:$0xff] }
   0xf   :  { %v379_v43 = vld [vmem:[%s3565_s5 + $0x88] sm:$0xff]  ;;  %v381_v45 = vld [vmem:[%s3565_s5 + $0x98] sm:$0xff]  ;;  %v2036_v46 = vld [vmem:[%s3565_s5 + $0x100] sm:$0xff] }
  0x10   :  { %v2451_v47 = vld [vmem:[%s3566_s0] sm:$0xff]  ;;  %v2456_v48 = vld [vmem:[%s3566_s0 + $0x8] sm:$0xff]  ;;  %v2038_v59 = vld [vmem:[%s3565_s5 + $0x110] sm:$0xff] }
  0x11   :  { %v41_v51 = vrot.slane %v2451_v47, 3  ;;  %v121_v52 = vrot.slane %v2456_v48, 3  ;;  %v45_v53 = vrot.slane %v2451_v47, 7  ;;  %v125_v54 = vrot.slane %v2456_v48, 7  ;;  %v2037_v0 = vld [vmem:[%s3565_s5 + $0x108] sm:$0xff]  ;;  %v2039_v1 = vld [vmem:[%s3565_s5 + $0x118] sm:$0xff] }
  0x12   :  { %133 = vperm.xlu1 %2262, %v115_v7   ;;  %v40_v55 = vrot.slane %v2451_v47, 2  ;;  %v120_v56 = vrot.slane %v2456_v48, 2  ;;  %v44_v57 = vrot.slane %v2451_v47, 6  ;;  %v124_v58 = vrot.slane %v2456_v48, 6 }
  0x13   :  { %128 = vperm.xlu0 %2261, %v114_v8   ;;  %242 = vperm.xlu2 %2263, %v228_v9   ;;  %v39_v60 = vrot.slane %v2451_v47, 1  ;;  %v119_v61 = vrot.slane %v2456_v48, 1  ;;  %v43_v62 = vrot.slane %v2451_v47, 5  ;;  %v123_v63 = vrot.slane %v2456_v48, 5 }
  0x14   :  { %v2483_v2 = vperm.slane %v41_v51, 0  ;;  %v2485_v3 = vperm.slane %v121_v52, 0  ;;  %v2487_v4 = vperm.slane %v45_v53, 0  ;;  %v2489_v5 = vperm.slane %v125_v54, 0 }
  0x15   :  { %v2493_v7 = vperm.slane %v40_v55, 0  ;;  %v2495_v8 = vperm.slane %v120_v56, 0  ;;  %v2497_v9 = vperm.slane %v44_v57, 0 }
  0x1a   :  { %232 = vperm.xlu1 %2262, %v226_v10   ;;  %v2499_v10 = vperm.slane %v124_v58, 0 }
  0x1b   :  { %247 = vperm.xlu0 %2261, %v229_v11   ;;  %237 = vperm.xlu2 %2263, %v227_v12   ;;  %v2501_v11 = vperm.slane %v39_v60, 0  ;;  %v2503_v12 = vperm.slane %v119_v61, 0 }
  0x22   :  { %401 = vperm.xlu1 %2262, %v363_v13   ;;  %v2505_v13 = vperm.slane %v43_v62, 0 }
  0x23   :  { %396 = vperm.xlu0 %2261, %v362_v14   ;;  %406 = vperm.xlu2 %2263, %v364_v15   ;;  %v2507_v14 = vperm.slane %v123_v63, 0 }
  0x2a   :  { %416 = vperm.xlu1 %2262, %v366_v16  }
  0x2b   :  { %411 = vperm.xlu0 %2261, %v365_v17   ;;  %421 = vperm.xlu2 %2263, %v367_v18  }
  0x32   :  { %431 = vperm.xlu1 %2262, %v369_v19   ;;  %v42_v19 = vrot.slane %v2451_v47, 4 }
  0x33   :  { %426 = vperm.xlu0 %2261, %v368_v20   ;;  %436 = vperm.xlu2 %2263, %v370_v21  }
  0x3a   :  { %446 = vperm.xlu1 %2262, %v372_v22  }
  0x3b   :  { %441 = vperm.xlu0 %2261, %v371_v23   ;;  %451 = vperm.xlu2 %2263, %v373_v24  }
  0x42   :  { %461 = vperm.xlu1 %2262, %v375_v25  }
  0x43   :  { %456 = vperm.xlu0 %2261, %v374_v26   ;;  %466 = vperm.xlu2 %2263, %v376_v27  }
  0x4a   :  { %476 = vperm.xlu1 %2262, %v378_v28  }
  0x4b   :  { %471 = vperm.xlu0 %2261, %v377_v29   ;;  %546 = vperm.xlu2 %2263, %v392_v30   ;;  %v2041_v29 = vld [vmem:[%s3565_s5 + $0x128] sm:$0xff] }
  0x52   :  { %536 = vperm.xlu1 %2262, %v390_v31  }
  0x53   :  { %551 = vperm.xlu0 %2261, %v393_v32   ;;  %541 = vperm.xlu2 %2263, %v391_v33   ;;  %v2554_v32 = vperm.slane %v2451_v47, 0  ;;  %v122_v33 = vrot.slane %v2456_v48, 4 }
  0x55   :  { %v2592_v54 = vperm.slane %v122_v33, 0  ;;  %v2045_v33 = vld [vmem:[%s3565_s5 + $0x148] sm:$0xff] }
  0x5a   :  { %531 = vperm.xlu1 %2262, %v389_v34   ;;  %v2040_v34 = vld [vmem:[%s3565_s5 + $0x120] sm:$0xff] }
  0x5b   :  { %526 = vperm.xlu0 %2261, %v388_v35   ;;  %516 = vperm.xlu2 %2263, %v386_v36   ;;  %v2042_v35 = vld [vmem:[%s3565_s5 + $0x130] sm:$0xff] }
  0x5d   :  { %v2440_v44 = vpop.permute.xlu2 %48 }
  0x5e   :  { %v2513_v16 = vmul.f32 %v2483_v2, %v2440_v44  ;;  %v2517_v17 = vmul.f32 %v2487_v4, %v2440_v44  ;;  %v2521_v18 = vmul.f32 %v2493_v7, %v2440_v44  ;;  %v2547_v30 = vmul.f32 %v2497_v9, %v2440_v44 }
  0x5f   :  { %v2551_v31 = vmul.f32 %v2501_v11, %v2440_v44  ;;  %v2580_v51 = vmul.f32 %v2505_v13, %v2440_v44 }
  0x62   :  { %506 = vperm.xlu1 %2262, %v384_v37  }
  0x63   :  { %521 = vperm.xlu0 %2261, %v387_v38   ;;  %511 = vperm.xlu2 %2263, %v385_v39  }
  0x65   :  { %v2491_v6 = vpop.permute.xlu2 %53 }
  0x66   :  { %v111_v52 = vmul.f32 %v2487_v4, %v2491_v6  ;;  %v2590_v53 = vmul.f32 %v2497_v9, %v2491_v6  ;;  %v2604_v60 = vmul.f32 %v2505_v13, %v2491_v6 }
  0x6a   :  { %501 = vperm.xlu1 %2262, %v383_v40  }
  0x6b   :  { %496 = vperm.xlu0 %2261, %v382_v41   ;;  %486 = vperm.xlu2 %2263, %v380_v42   ;;  %v2572_v42 = vperm.slane %v2456_v48, 0  ;;  %v2586_v48 = vmul.f32 %v2493_v7, %v2491_v6 }
  0x6d   :  { %v2594_v55 = vpop.permute.xlu2 %242 }
  0x6e   :  { %3573 = vst [vmem:[#allocation3_spill] sm:$0xff] %v2594_v55 }
  0x72   :  { %481 = vperm.xlu1 %2262, %v379_v43   ;;  %v2574_v43 = vperm.slane %v42_v19, 0 }
  0x73   :  { %491 = vperm.xlu0 %2261, %v381_v45   ;;  %1008 = vperm.xlu2 %2263, %v2036_v46   ;;  %v95_v45 = vmul.f32 %v2483_v2, %v2491_v6 }
  0x74   :  { %v2458_v49 = vpop.permute.xlu1 %138 }
  0x75   :  { %v2460_v50 = vpop.permute.xlu0 %58  ;;  %v176_v22 = vmul.f32 %v2485_v3, %v2458_v49  ;;  %v192_v24 = vmul.f32 %v2489_v5, %v2458_v49  ;;  %v172_v26 = vmul.f32 %v2495_v8, %v2458_v49  ;;  %v188_v28 = vmul.f32 %v2499_v10, %v2458_v49 }
  0x76   :  { %v96_v21 = vmul.f32 %v2483_v2, %v2460_v50  ;;  %v112_v23 = vmul.f32 %v2487_v4, %v2460_v50  ;;  %v92_v25 = vmul.f32 %v2493_v7, %v2460_v50  ;;  %v108_v27 = vmul.f32 %v2497_v9, %v2460_v50 }
  0x77   :  { %v88_v36 = vmul.f32 %v2501_v11, %v2460_v50  ;;  %v168_v37 = vmul.f32 %v2503_v12, %v2458_v49  ;;  %v104_v38 = vmul.f32 %v2505_v13, %v2460_v50  ;;  %v184_v39 = vmul.f32 %v2507_v14, %v2458_v49 }
  0x78   :  { %v208_v40 = vadd.f32 %v176_v22, %v96_v21  ;;  %v224_v41 = vadd.f32 %v192_v24, %v112_v23  ;;  %v204_v46 = vadd.f32 %v172_v26, %v92_v25  ;;  %v220_v47 = vadd.f32 %v188_v28, %v108_v27  ;;  %v2044_v24 = vld [vmem:[%s3565_s5 + $0x140] sm:$0xff] }
  0x79   :  { %v200_v57 = vadd.f32 %v168_v37, %v88_v36  ;;  %v216_v58 = vadd.f32 %v184_v39, %v104_v38 }
  0x7a   :  { %1018 = vperm.xlu1 %2262, %v2038_v59   ;;  %v2600_v59 = vmul.f32 %v2501_v11, %v2491_v6  ;;  %v2609_v62 = vadd.f32 %v2594_v55, %v208_v40  ;;  %v2612_v63 = vadd.f32 %v2594_v55, %v224_v41  ;;  %v2623_v22 = vadd.f32 %v2594_v55, %v204_v46 }
  0x7b   :  { %1013 = vperm.xlu0 %2261, %v2037_v0   ;;  %1023 = vperm.xlu2 %2263, %v2039_v1   ;;  %v84_v0 = vmul.f32 %v2554_v32, %v2460_v50  ;;  %v164_v1 = vmul.f32 %v2572_v42, %v2458_v49  ;;  %v2626_v23 = vadd.f32 %v2594_v55, %v220_v47 }
  0x7c   :  { %v2509_v15 = vpop.permute.xlu1 %143  ;;  %v2663_v40 = vadd.f32 %v2594_v55, %v200_v57 }
  0x7d   :  { %v2524_v20 = vpop.permute.xlu0 %63  ;;  %v177_v19 = vmul.f32 %v2485_v3, %v2509_v15  ;;  %v193_v21 = vmul.f32 %v2489_v5, %v2509_v15  ;;  %v173_v27 = vmul.f32 %v2495_v8, %v2509_v15  ;;  %v189_v28 = vmul.f32 %v2499_v10, %v2509_v15 }
  0x7e   :  { %v97_v25 = vmul.f32 %v2483_v2, %v2524_v20  ;;  %v113_v26 = vmul.f32 %v2487_v4, %v2524_v20  ;;  %v93_v36 = vmul.f32 %v2493_v7, %v2524_v20  ;;  %v109_v37 = vmul.f32 %v2497_v9, %v2524_v20 }
  0x7f   :  { %v89_v38 = vmul.f32 %v2501_v11, %v2524_v20  ;;  %v169_v39 = vmul.f32 %v2503_v12, %v2509_v15  ;;  %v2668_v41 = vadd.f32 %v164_v1, %v84_v0  ;;  %v312_v11 = vmax.f32 %v2612_v63, 0.0 }
  0x80   :  { %v209_v7 = vadd.f32 %v177_v19, %v97_v25  ;;  %v225_v9 = vadd.f32 %v193_v21, %v113_v26  ;;  %v105_v46 = vmul.f32 %v2505_v13, %v2524_v20  ;;  %v205_v0 = vadd.f32 %v173_v27, %v93_v36 }
  0x81   :  { %v221_v1 = vadd.f32 %v189_v28, %v109_v37  ;;  %v185_v19 = vmul.f32 %v2507_v14, %v2509_v15  ;;  %v2046_v28 = vld [vmem:[%s3565_s5 + $0x150] sm:$0xff]  ;;  %v165_v37 = vmul.f32 %v2572_v42, %v2509_v15 }
  0x82   :  { %1033 = vperm.xlu1 %2262, %v2041_v29   ;;  %v2043_v29 = vld [vmem:[%s3565_s5 + $0x138] sm:$0xff] }
  0x83   :  { %1028 = vperm.xlu0 %2261, %v2040_v34   ;;  %1038 = vperm.xlu2 %2263, %v2042_v35  }
  0x84   :  { %v2596_v56 = vpop.permute.xlu1 %133 }
  0x85   :  { %v2606_v61 = vpop.permute.xlu0 %128  ;;  %v175_v4 = vmul.f32 %v2485_v3, %v2596_v56  ;;  %v191_v35 = vmul.f32 %v2489_v5, %v2596_v56  ;;  %v171_v25 = vmul.f32 %v2495_v8, %v2596_v56  ;;  %v187_v27 = vmul.f32 %v2499_v10, %v2596_v56 }
  0x86   :  { %v174_v2 = vmul.f32 %v2485_v3, %v2606_v61  ;;  %v190_v34 = vmul.f32 %v2489_v5, %v2606_v61  ;;  %v296_v3 = vmax.f32 %v2609_v62, 0.0  ;;  %v2666_v5 = vadd.f32 %v2594_v55, %v216_v58 }
  0x87   :  { %v207_v57 = vadd.f32 %v175_v4, %v95_v45  ;;  %v223_v58 = vadd.f32 %v191_v35, %v111_v52  ;;  %v2685_v45 = vpop.permute.xlu2 %237  ;;  %v170_v52 = vmul.f32 %v2495_v8, %v2606_v61  ;;  %v186_v26 = vmul.f32 %v2499_v10, %v2606_v61 }
  0x88   :  { %v206_v62 = vadd.f32 %v174_v2, %v2513_v16  ;;  %v85_v10 = vmul.f32 %v2554_v32, %v2524_v20 }
  0x89   :  { %v279_v8 = vadd.f32 %v2685_v45, %v223_v58  ;;  %v100_v58 = vmul.f32 %v2574_v43, %v2460_v50 }
  0x8a   :  { %1048 = vperm.xlu1 %2262, %v2044_v24   ;;  %v222_v24 = vadd.f32 %v190_v34, %v2517_v17  ;;  %v2047_v17 = vld [vmem:[%s3565_s5 + $0x158] sm:$0xff]  ;;  %v263_v34 = vadd.f32 %v2685_v45, %v207_v57  ;;  %v202_v57 = vadd.f32 %v170_v52, %v2521_v18  ;;  %v167_v18 = vmul.f32 %v2503_v12, %v2596_v56 }
  0x8b   :  { %1043 = vperm.xlu0 %2261, %v2043_v29   ;;  %1053 = vperm.xlu2 %2263, %v2045_v33   ;;  %v201_v29 = vadd.f32 %v169_v39, %v89_v38  ;;  %v2048_v33 = vld [vmem:[%s3565_s5 + $0x160] sm:$0xff]  ;;  %v182_v52 = vmul.f32 %v2507_v14, %v2606_v61 }
  0x8c   :  { %v2673_v47 = vpop.permute.xlu1 %232 }
  0x8d   :  { %v2677_v55 = vpop.permute.xlu0 %247  ;;  %v262_v21 = vadd.f32 %v2673_v47, %v206_v62  ;;  %v278_v16 = vadd.f32 %v2673_v47, %v222_v24  ;;  %v292_v62 = vmax.f32 %v2623_v22, 0.0  ;;  %v218_v24 = vadd.f32 %v186_v26, %v2547_v30  ;;  %v2051_v26 = vld [vmem:[%s3565_s5 + $0x178] sm:$0xff] }
  0x8e   :  { %v265_v63 = vadd.f32 %v2677_v55, %v209_v7  ;;  %v281_v13 = vadd.f32 %v2677_v55, %v225_v9  ;;  %v261_v35 = vadd.f32 %v2677_v55, %v205_v0  ;;  %v277_v36 = vadd.f32 %v2677_v55, %v221_v1 }
  0x8f   :  { %v294_v7 = vmax.f32 %v262_v21, 0.0  ;;  %v310_v9 = vmax.f32 %v278_v16, 0.0  ;;  %v295_v0 = vmax.f32 %v263_v34, 0.0  ;;  %v311_v1 = vmax.f32 %v279_v8, 0.0 }
  0x90   :  { %v297_v2 = vmax.f32 %v265_v63, 0.0  ;;  %v313_v4 = vmax.f32 %v281_v13, 0.0  ;;  %v258_v63 = vadd.f32 %v2673_v47, %v202_v57  ;;  %v274_v13 = vadd.f32 %v2673_v47, %v218_v24 }
  0x91   :  { %v101_v30 = vmul.f32 %v2574_v43, %v2524_v20  ;;  %v352_v22 = vpack.c.bf16 %v295_v0, %v294_v7  ;;  %v360_v50 = vpack.c.bf16 %v311_v1, %v310_v9  ;;  %v293_v21 = vmax.f32 %v261_v35, 0.0  ;;  %v2049_v20 = vld [vmem:[%s3565_s5 + $0x168] sm:$0xff] }
  0x92   :  { %1063 = vperm.xlu1 %2262, %v2047_v17   ;;  %v353_v38 = vpack.c.bf16 %v297_v2, %v296_v3  ;;  %v361_v39 = vpack.c.bf16 %v313_v4, %v312_v11  ;;  %v203_v3 = vadd.f32 %v171_v25, %v2586_v48  ;;  %v219_v11 = vadd.f32 %v187_v27, %v2590_v53  ;;  %v2050_v48 = vld [vmem:[%s3565_s5 + $0x170] sm:$0xff] }
  0x93   :  { %1058 = vperm.xlu0 %2261, %v2046_v28   ;;  %1068 = vperm.xlu2 %2263, %v2048_v33   ;;  %v309_v16 = vmax.f32 %v277_v36, 0.0  ;;  %v217_v17 = vadd.f32 %v185_v19, %v105_v46  ;;  %v166_v53 = vmul.f32 %v2503_v12, %v2606_v61  ;;  %v183_v25 = vmul.f32 %v2507_v14, %v2596_v56 }
  0x94   :  { %714 = vmatpush.bf16.msra.mxu0 %v353_v38  ;;  %803 = vmatpush.bf16.msra.mxu1 %v361_v39  ;;  %v308_v46 = vmax.f32 %v2626_v23, 0.0  ;;  %v259_v12 = vadd.f32 %v2685_v45, %v203_v3  ;;  %v275_v19 = vadd.f32 %v2685_v45, %v219_v11  ;;  %v180_v27 = vmul.f32 %v2592_v54, %v2458_v49  ;;  %v2054_v3 = vld [vmem:[%s3565_s5 + $0x190] sm:$0xff] }
  0x95   :  { %v290_v14 = vmax.f32 %v258_v63, 0.0  ;;  %v257_v28 = vadd.f32 %v2677_v55, %v201_v29  ;;  %v199_v33 = vadd.f32 %v167_v18, %v2600_v59  ;;  %v181_v2 = vmul.f32 %v2592_v54, %v2509_v15 }
  0x96   :  { %v351_v4 = vpack.c.bf16 %v293_v21, %v292_v62  ;;  %v359_v34 = vpack.c.bf16 %v309_v16, %v308_v46  ;;  %v306_v8 = vmax.f32 %v274_v13, 0.0  ;;  %v273_v23 = vadd.f32 %v2677_v55, %v217_v17 }
  0x97   :  { %v288_v35 = vmax.f32 %v2663_v40, 0.0  ;;  %v198_v49 = vadd.f32 %v166_v53, %v2551_v31  ;;  %v214_v36 = vadd.f32 %v182_v52, %v2580_v51  ;;  %v215_v29 = vadd.f32 %v183_v25, %v2604_v60 }
  0x98   :  { %715 = vmatpush.bf16.msra.mxu0 %v352_v22  ;;  %804 = vmatpush.bf16.msra.mxu1 %v360_v50  ;;  %v291_v59 = vmax.f32 %v259_v12, 0.0  ;;  %v307_v15 = vmax.f32 %v275_v19, 0.0  ;;  %v197_v38 = vadd.f32 %v165_v37, %v85_v10  ;;  %v82_v39 = vmul.f32 %v2554_v32, %v2440_v44  ;;  %v2053_v10 = vld [vmem:[%s3565_s5 + $0x188] sm:$0xff]  ;;  %v2055_v12 = vld [vmem:[%s3565_s5 + $0x198] sm:$0xff] }
  0x99   :  { %v289_v7 = vmax.f32 %v257_v28, 0.0  ;;  %v254_v9 = vadd.f32 %v2673_v47, %v198_v49  ;;  %v270_v62 = vadd.f32 %v2673_v47, %v214_v36  ;;  %v83_v31 = vmul.f32 %v2554_v32, %v2491_v6  ;;  %v2052_v32 = vld [vmem:[%s3565_s5 + $0x180] sm:$0xff]  ;;  %v2057_v19 = vld [vmem:[%s3565_s5 + $0x1a8] sm:$0xff] }
  0x9a   :  { %1078 = vperm.xlu1 %2262, %v2050_v48   ;;  %v350_v40 = vpack.c.bf16 %v291_v59, %v290_v14  ;;  %v358_v51 = vpack.c.bf16 %v307_v15, %v306_v8  ;;  %v305_v57 = vmax.f32 %v273_v23, 0.0  ;;  %v255_v60 = vadd.f32 %v2685_v45, %v199_v33  ;;  %v2197_v49 = vld [vmem:[%s3567_s4 + $0x4] sm:$0xf0]  ;;  %v1880_v36 = vld [vmem:[%s3567_s4 + $0x8] sm:$0xf0]  ;;  %v2059_v15 = vld [vmem:[%s3565_s5 + $0x1b8] sm:$0xff] }
  0x9b   :  { %1073 = vperm.xlu0 %2261, %v2049_v20   ;;  %1083 = vperm.xlu2 %2263, %v2051_v26   ;;  %v271_v37 = vadd.f32 %v2685_v45, %v215_v29  ;;  %v212_v24 = vadd.f32 %v180_v27, %v100_v58  ;;  %v213_v0 = vadd.f32 %v181_v2, %v101_v30  ;;  %v304_v11 = vmax.f32 %v2666_v5, 0.0 }
  0x9c   :  { %716 = vmatpush.bf16.msra.mxu0 %v351_v4  ;;  %805 = vmatpush.bf16.msra.mxu1 %v359_v34  ;;  %v162_v1 = vmul.f32 %v2572_v42, %v2606_v61  ;;  %v163_v63 = vmul.f32 %v2572_v42, %v2596_v56  ;;  %v178_v58 = vmul.f32 %v2592_v54, %v2606_v61  ;;  %v286_v30 = vmax.f32 %v254_v9, 0.0 }
  0x9d   :  { %v179_v13 = vmul.f32 %v2592_v54, %v2596_v56  ;;  %v349_v18 = vpack.c.bf16 %v289_v7, %v288_v35  ;;  %v302_v22 = vmax.f32 %v270_v62, 0.0  ;;  %v253_v50 = vadd.f32 %v2677_v55, %v197_v38  ;;  %v3574_v54 = vld [vmem:[#allocation3_spill] sm:$0xff]  ;;  %v2058_v38 = vld [vmem:[%s3565_s5 + $0x1b0] sm:$0xff] }
  0x9e   :  { %v357_v21 = vpack.c.bf16 %v305_v57, %v304_v11  ;;  %v269_v16 = vadd.f32 %v2677_v55, %v213_v0  ;;  %v98_v5 = vmul.f32 %v2574_v43, %v2440_v44  ;;  %v99_v42 = vmul.f32 %v2574_v43, %v2491_v6  ;;  %v1878_v35 = vld [vmem:[%s3567_s4] sm:$0xf]  ;;  %v2062_v62 = vld [vmem:[%s3565_s5 + $0x1d0] sm:$0xff]  ;;  %v2199_v57 = vld [vmem:[%s3567_s4 + $0x14] sm:$0xf0] }
  0x9f   :  { %v287_v61 = vmax.f32 %v255_v60, 0.0  ;;  %v252_v56 = vadd.f32 %v3574_v54, %v2668_v41  ;;  %v268_v48 = vadd.f32 %v3574_v54, %v212_v24  ;;  %v194_v17 = vadd.f32 %v162_v1, %v82_v39  ;;  %v2056_v41 = vld [vmem:[%s3565_s5 + $0x1a0] sm:$0xff]  ;;  %v2198_v60 = vld [vmem:[%s3567_s4 + $0x14] sm:$0xf]  ;;  %v2067_v11 = vld [vmem:[%s3565_s5 + $0x1f8] sm:$0xff] }
  0xa0   :  { %717 = vmatpush.bf16.msra.mxu0 %v350_v40  ;;  %806 = vmatpush.bf16.msra.mxu1 %v358_v51  ;;  %v303_v53 = vmax.f32 %v271_v37, 0.0  ;;  %v195_v52 = vadd.f32 %v163_v63, %v83_v31  ;;  %v210_v55 = vadd.f32 %v178_v58, %v98_v5  ;;  %v211_v25 = vadd.f32 %v179_v13, %v99_v42  ;;  %v2060_v39 = vld [vmem:[%s3565_s5 + $0x1c0] sm:$0xff]  ;;  %v2061_v31 = vld [vmem:[%s3565_s5 + $0x1c8] sm:$0xff]  ;;  %v2063_v40 = vld [vmem:[%s3565_s5 + $0x1d8] sm:$0xff] }
  0xa1   :  { %v348_v20 = vpack.c.bf16 %v287_v61, %v286_v30  ;;  %v285_v44 = vmax.f32 %v253_v50, 0.0  ;;  %v301_v46 = vmax.f32 %v269_v16, 0.0  ;;  %v250_v6 = vadd.f32 %v2673_v47, %v194_v17  ;;  %v1886_v51 = vld [vmem:[%s3567_s4 + $0x10] sm:$0xf]  ;;  %v2065_v37 = vld [vmem:[%s3565_s5 + $0x1e8] sm:$0xff]  ;;  %v2064_v24 = vld [vmem:[%s3565_s5 + $0x1e0] sm:$0xff] }
  0xa2   :  { %1093 = vperm.xlu1 %2262, %v2053_v10   ;;  %v356_v26 = vpack.c.bf16 %v303_v53, %v302_v22  ;;  %v266_v43 = vadd.f32 %v2673_v47, %v210_v55  ;;  %v284_v27 = vmax.f32 %v252_v56, 0.0  ;;  %v300_v14 = vmax.f32 %v268_v48, 0.0  ;;  %v1888_v10 = vld [vmem:[%s3567_s4 + $0x18] sm:$0xf0]  ;;  %v2066_v0 = vld [vmem:[%s3565_s5 + $0x1f0] sm:$0xff]  ;;  %v1537_v63 = vld [vmem:[%s3568_s6 + $0x8] sm:$0xff] }
  0xa3   :  { %1088 = vperm.xlu0 %2261, %v2052_v32   ;;  %1098 = vperm.xlu2 %2263, %v2054_v3   ;;  %v251_v28 = vadd.f32 %v2685_v45, %v195_v52  ;;  %v267_v47 = vadd.f32 %v2685_v45, %v211_v25  ;;  %v282_v4 = vmax.f32 %v250_v6, 0.0  ;;  %v2196_v45 = vld [vmem:[%s3567_s4 + $0x4] sm:$0xf]  ;;  %v1879_v7 = vor.u32 %v2197_v49, %v1878_v35  ;;  %v1894_v58 = vld [vmem:[%s3567_s4 + $0x20] sm:$0xf]  ;;  %v1539_v22 = vld [vmem:[%s3568_s6 + $0x18] sm:$0xff] }
  0xa4   :  { %718 = vmatpush.bf16.msra.mxu0 %v349_v18  ;;  %807 = vmatpush.bf16.msra.mxu1 %v357_v21  ;;  %v347_v33 = vpack.c.bf16 %v285_v44, %v284_v27  ;;  %v355_v2 = vpack.c.bf16 %v301_v46, %v300_v14  ;;  %v298_v34 = vmax.f32 %v266_v43, 0.0  ;;  %v1883_v9 = vor.u32 %v2196_v45, %v1880_v36  ;;  %v1536_v3 = vld [vmem:[%s3568_s6] sm:$0xff]  ;;  %v2201_v13 = vld [vmem:[%s3567_s4 + $0x24] sm:$0xf0]  ;;  %v1896_v30 = vld [vmem:[%s3567_s4 + $0x28] sm:$0xf0] }
  0xa5   :  { %v283_v8 = vmax.f32 %v251_v28, 0.0  ;;  %v299_v23 = vmax.f32 %v267_v47, 0.0  ;;  %v1887_v1 = vor.u32 %v2199_v57, %v1886_v51  ;;  %v1891_v32 = vor.u32 %v2198_v60, %v1888_v10  ;;  %v2200_v18 = vld [vmem:[%s3567_s4 + $0x24] sm:$0xf]  ;;  %v1538_v50 = vld [vmem:[%s3568_s6 + $0x10] sm:$0xff]  ;;  %v1541_v61 = vld [vmem:[%s3568_s6 + $0x28] sm:$0xff] }
  0xa6   :  { %v1540_v21 = vld [vmem:[%s3568_s6 + $0x20] sm:$0xff]  ;;  %v1895_v16 = vor.u32 %v2201_v13, %v1894_v58  ;;  %v1899_v5 = vor.u32 %v2200_v18, %v1896_v30  ;;  %v1542_v42 = vld [vmem:[%s3568_s6 + $0x30] sm:$0xff]  ;;  %v1543_v54 = vld [vmem:[%s3568_s6 + $0x38] sm:$0xff]  ;;  %v13_v45 = vstv %s3569_s7 }
  0xa7   :  { %v346_v29 = vpack.c.bf16 %v283_v8, %v282_v4  ;;  %v354_v59 = vpack.c.bf16 %v299_v23, %v298_v34  ;;  %v1902_v56 = vld [vmem:[%s3567_s4 + $0x30] sm:$0xf]  ;;  %v2203_v48 = vld [vmem:[%s3567_s4 + $0x34] sm:$0xf0]  ;;  %v2202_v17 = vld [vmem:[%s3567_s4 + $0x34] sm:$0xf] }
  0xa8   :  { %719 = vmatpush.bf16.msra.mxu0 %v348_v20  ;;  %808 = vmatpush.bf16.msra.mxu1 %v356_v26  ;;  %v1904_v53 = vld [vmem:[%s3567_s4 + $0x38] sm:$0xf0]  ;;  %v1545_v52 = vld [vmem:[%s3568_s6 + $0x48] sm:$0xff]  ;;  %v1544_v55 = vld [vmem:[%s3568_s6 + $0x40] sm:$0xff]  ;;  %v1903_v20 = vor.u32 %v2203_v48, %v1902_v56  ;;  %14 = vst [vmem:[#allocation2] sm:$0x1] %v13_v45 }
  0xa9   :  { %v1546_v25 = vld [vmem:[%s3568_s6 + $0x50] sm:$0xff]  ;;  %v1907_v44 = vor.u32 %v2202_v17, %v1904_v53  ;;  %v1548_v26 = vld [vmem:[%s3568_s6 + $0x60] sm:$0xff]  ;;  %v1547_v46 = vld [vmem:[%s3568_s6 + $0x58] sm:$0xff]  ;;  %v402_v53 = vpop.permute.xlu1 %401 }
  0xaa   :  { %1108 = vperm.xlu1 %2262, %v2056_v41   ;;  %v1549_v6 = vld [vmem:[%s3568_s6 + $0x68] sm:$0xff]  ;;  %v1910_v43 = vld [vmem:[%s3567_s4 + $0x40] sm:$0xf]  ;;  %v1551_v27 = vld [vmem:[%s3568_s6 + $0x78] sm:$0xff] }
  0xab   :  { %1103 = vperm.xlu0 %2261, %v2055_v12   ;;  %1113 = vperm.xlu2 %2263, %v2057_v19   ;;  %v2205_v41 = vld [vmem:[%s3567_s4 + $0x44] sm:$0xf0]  ;;  %v2204_v12 = vld [vmem:[%s3567_s4 + $0x44] sm:$0xf]  ;;  %v1912_v19 = vld [vmem:[%s3567_s4 + $0x48] sm:$0xf0] }
  0xac   :  { %720 = vmatpush.bf16.msra.mxu0 %v347_v33  ;;  %809 = vmatpush.bf16.msra.mxu1 %v355_v2  ;;  %v1550_v14 = vld [vmem:[%s3568_s6 + $0x70] sm:$0xff]  ;;  %v1552_v28 = vld [vmem:[%s3568_s6 + $0x80] sm:$0xff]  ;;  %v1911_v47 = vor.u32 %v2205_v41, %v1910_v43  ;;  %v1915_v33 = vor.u32 %v2204_v12, %v1912_v19  ;;  %v1553_v4 = vld [vmem:[%s3568_s6 + $0x88] sm:$0xff]  ;;  %v407_v12 = vpop.permute.xlu2 %406 }
  0xad   :  { %v1554_v2 = vld [vmem:[%s3568_s6 + $0x90] sm:$0xff]  ;;  %v1555_v34 = vld [vmem:[%s3568_s6 + $0x98] sm:$0xff]  ;;  %v1557_v36 = vld [vmem:[%s3568_s6 + $0xa8] sm:$0xff] }
  0xae   :  { %v1918_v8 = vld [vmem:[%s3567_s4 + $0x50] sm:$0xf]  ;;  %v2207_v23 = vld [vmem:[%s3567_s4 + $0x54] sm:$0xf0]  ;;  %v2206_v35 = vld [vmem:[%s3567_s4 + $0x54] sm:$0xf] }
  0xaf   :  { %v1920_v49 = vld [vmem:[%s3567_s4 + $0x58] sm:$0xf0]  ;;  %v1928_v51 = vld [vmem:[%s3567_s4 + $0x68] sm:$0xf0]  ;;  %v1562_v57 = vld [vmem:[%s3568_s6 + $0xd0] sm:$0xff] }
  0xb0   :  { %721 = vmatpush.bf16.msra.mxu0 %v346_v29  ;;  %810 = vmatpush.bf16.msra.mxu1 %v354_v59  ;;  %v1556_v29 = vld [vmem:[%s3568_s6 + $0xa0] sm:$0xff]  ;;  %v1558_v59 = vld [vmem:[%s3568_s6 + $0xb0] sm:$0xff]  ;;  %v1565_v60 = vld [vmem:[%s3568_s6 + $0xe8] sm:$0xff] }
  0xb1   :  { %v1559_v10 = vld [vmem:[%s3568_s6 + $0xb8] sm:$0xff]  ;;  %v2264_v13 = vld [vmem:[#allocation2] ss:$0 sm:$0xff]  ;;  %v2217_v45 = vld [vmem:[%s3567_s4 + $0xa4] sm:$0xf0] }
  0xb2   :  { %1123 = vperm.xlu1 %2262, %v2059_v15   ;;  %v1919_v15 = vor.u32 %v2207_v23, %v1918_v8  ;;  %v1936_v58 = vld [vmem:[%s3567_s4 + $0x78] sm:$0xf0] }
  0xb3   :  { %1118 = vperm.xlu0 %2261, %v2058_v38   ;;  %1128 = vperm.xlu2 %2263, %v2060_v39   ;;  %v1923_v38 = vor.u32 %v2206_v35, %v1920_v49  ;;  %v1561_v39 = vld [vmem:[%s3568_s6 + $0xc8] sm:$0xff]  ;;  %v1958_v49 = vld [vmem:[%s3567_s4 + $0xa0] sm:$0xf] }
  0xb4   :  { %722 = vmatmul.bf16.vlgmr.msra.gmra.mxu0 %v1879_v7  ;;  %811 = vmatmul.bf16.vlgmr.msra.gmra.mxu1 %v1883_v9  ;;  %v1560_v7 = vld [vmem:[%s3568_s6 + $0xc0] sm:$0xff] }
  0xb5   :  { %v1564_v9 = vld [vmem:[%s3568_s6 + $0xe0] sm:$0xff] }
  0xba   :  { %1138 = vperm.xlu1 %2262, %v2062_v62   ;;  %v1926_v62 = vld [vmem:[%s3567_s4 + $0x60] sm:$0xf] }
  0xbb   :  { %1133 = vperm.xlu0 %2261, %v2061_v31   ;;  %1143 = vperm.xlu2 %2263, %v2063_v40   ;;  %v2209_v31 = vld [vmem:[%s3567_s4 + $0x64] sm:$0xf0]  ;;  %v2208_v40 = vld [vmem:[%s3567_s4 + $0x64] sm:$0xf] }
  0xc2   :  { %1153 = vperm.xlu1 %2262, %v2065_v37   ;;  %v1927_v37 = vor.u32 %v2209_v31, %v1926_v62 }
  0xc3   :  { %1148 = vperm.xlu0 %2261, %v2064_v24   ;;  %1158 = vperm.xlu2 %2263, %v2066_v0   ;;  %v1931_v24 = vor.u32 %v2208_v40, %v1928_v51  ;;  %v1563_v0 = vld [vmem:[%s3568_s6 + $0xd8] sm:$0xff] }
  0xc4   :  { %727 = vmatmul.bf16.gmra.mxu0 %v1887_v1  ;;  %816 = vmatmul.bf16.gmra.mxu1 %v1891_v32  ;;  %v1566_v1 = vld [vmem:[%s3568_s6 + $0xf0] sm:$0xff]  ;;  %v1567_v32 = vld [vmem:[%s3568_s6 + $0xf8] sm:$0xff] }
  0xca   :  { %1570 = vperm.xlu1 %2262, %v1536_v3   ;;  %v1934_v3 = vld [vmem:[%s3567_s4 + $0x70] sm:$0xf] }
  0xcb   :  { %1163 = vperm.xlu0 %2261, %v2067_v11   ;;  %1575 = vperm.xlu2 %2263, %v1537_v63   ;;  %v2211_v11 = vld [vmem:[%s3567_s4 + $0x74] sm:$0xf0]  ;;  %v2210_v63 = vld [vmem:[%s3567_s4 + $0x74] sm:$0xf] }
  0xcc   :  { %v1935_v18 = vor.u32 %v2211_v11, %v1934_v3  ;;  %v1939_v30 = vor.u32 %v2210_v63, %v1936_v58  ;;  %v1968_v3 = vld [vmem:[%s3567_s4 + $0xb8] sm:$0xf0] }
  0xd2   :  { %1585 = vperm.xlu1 %2262, %v1539_v22   ;;  %v1942_v22 = vld [vmem:[%s3567_s4 + $0x80] sm:$0xf] }
  0xd3   :  { %1580 = vperm.xlu0 %2261, %v1538_v50   ;;  %1590 = vperm.xlu2 %2263, %v1540_v21   ;;  %v2213_v50 = vld [vmem:[%s3567_s4 + $0x84] sm:$0xf0]  ;;  %v2212_v21 = vld [vmem:[%s3567_s4 + $0x84] sm:$0xf] }
  0xd4   :  { %732 = vmatmul.bf16.gmra.mxu0 %v1895_v16  ;;  %821 = vmatmul.bf16.gmra.mxu1 %v1899_v5  ;;  %v1944_v16 = vld [vmem:[%s3567_s4 + $0x88] sm:$0xf0]  ;;  %v397_v5 = vpop.permute.xlu0 %396 }
  0xda   :  { %1600 = vperm.xlu1 %2262, %v1542_v42   ;;  %v1943_v42 = vor.u32 %v2213_v50, %v1942_v22 }
  0xdb   :  { %1595 = vperm.xlu0 %2261, %v1541_v61   ;;  %1605 = vperm.xlu2 %2263, %v1543_v54   ;;  %v1947_v61 = vor.u32 %v2212_v21, %v1944_v16 }
  0xe2   :  { %1615 = vperm.xlu1 %2262, %v1545_v52  }
  0xe3   :  { %1610 = vperm.xlu0 %2261, %v1544_v55   ;;  %1620 = vperm.xlu2 %2263, %v1546_v25  }
  0xe4   :  { %737 = vmatmul.bf16.gmra.mxu0 %v1903_v20  ;;  %826 = vmatmul.bf16.gmra.mxu1 %v1907_v44  ;;  %v1950_v44 = vld [vmem:[%s3567_s4 + $0x90] sm:$0xf] }
  0xea   :  { %1630 = vperm.xlu1 %2262, %v1548_v26   ;;  %v2215_v26 = vld [vmem:[%s3567_s4 + $0x94] sm:$0xf0] }
  0xeb   :  { %1625 = vperm.xlu0 %2261, %v1547_v46   ;;  %1635 = vperm.xlu2 %2263, %v1549_v6   ;;  %v2214_v46 = vld [vmem:[%s3567_s4 + $0x94] sm:$0xf]  ;;  %v1952_v6 = vld [vmem:[%s3567_s4 + $0x98] sm:$0xf0]  ;;  %v1951_v19 = vor.u32 %v2215_v26, %v1950_v44 }
  0xf2   :  { %1645 = vperm.xlu1 %2262, %v1551_v27   ;;  %v1955_v27 = vor.u32 %v2214_v46, %v1952_v6 }
  0xf3   :  { %1640 = vperm.xlu0 %2261, %v1550_v14   ;;  %1650 = vperm.xlu2 %2263, %v1552_v28  }
  0xf4   :  { %742 = vmatmul.bf16.gmra.mxu0 %v1911_v47  ;;  %831 = vmatmul.bf16.gmra.mxu1 %v1915_v33 }
  0xfa   :  { %1660 = vperm.xlu1 %2262, %v1554_v2  }
  0xfb   :  { %1655 = vperm.xlu0 %2261, %v1553_v4   ;;  %1665 = vperm.xlu2 %2263, %v1555_v34   ;;  %v412_v4 = vpop.permute.xlu0 %411 }
 0x102   :  { %1675 = vperm.xlu1 %2262, %v1557_v36   ;;  %v2216_v36 = vld [vmem:[%s3567_s4 + $0xa4] sm:$0xf] }
 0x103   :  { %1670 = vperm.xlu0 %2261, %v1556_v29   ;;  %1680 = vperm.xlu2 %2263, %v1558_v59   ;;  %v1960_v29 = vld [vmem:[%s3567_s4 + $0xa8] sm:$0xf0]  ;;  %v427_v58 = vpop.permute.xlu0 %426 }
 0x104   :  { %747 = vmatmul.bf16.gmra.mxu0 %v1919_v15  ;;  %836 = vmatmul.bf16.gmra.mxu1 %v1923_v38  ;;  %v417_v38 = vpop.permute.xlu1 %416 }
 0x10a   :  { %1695 = vperm.xlu1 %2262, %v1561_v39   ;;  %v1959_v39 = vor.u32 %v2217_v45, %v1958_v49 }
 0x10b   :  { %1690 = vperm.xlu0 %2261, %v1560_v7   ;;  %1710 = vperm.xlu2 %2263, %v1564_v9   ;;  %v1963_v7 = vor.u32 %v2216_v36, %v1960_v29  ;;  %v442_v45 = vpop.permute.xlu0 %441 }
 0x112   :  { %1700 = vperm.xlu1 %2262, %v1562_v57   ;;  %v422_v57 = vpop.permute.xlu2 %421 }
 0x113   :  { %1715 = vperm.xlu0 %2261, %v1565_v60   ;;  %1685 = vperm.xlu2 %2263, %v1559_v10  }
 0x114   :  { %752 = vmatmul.bf16.gmra.mxu0 %v1927_v37  ;;  %841 = vmatmul.bf16.gmra.mxu1 %v1931_v24 }
 0x11a   :  { %1705 = vperm.xlu1 %2262, %v1563_v0   ;;  %v1966_v0 = vld [vmem:[%s3567_s4 + $0xb0] sm:$0xf] }
 0x11b   :  { %1720 = vperm.xlu0 %2261, %v1566_v1   ;;  %1725 = vperm.xlu2 %2263, %v1567_v32   ;;  %v2219_v1 = vld [vmem:[%s3567_s4 + $0xb4] sm:$0xf0]  ;;  %v2218_v32 = vld [vmem:[%s3567_s4 + $0xb4] sm:$0xf] }
 0x123   :  { %1836 = vperm.xlu0 %2261, %v2264_v13   ;;  %v1967_v13 = vor.u32 %v2219_v1, %v1966_v0 }
 0x124   :  { %757 = vmatmul.bf16.gmra.mxu0 %v1935_v18  ;;  %846 = vmatmul.bf16.gmra.mxu1 %v1939_v30  ;;  %v1971_v18 = vor.u32 %v2218_v32, %v1968_v3 }
 0x131   :  { %v723_v54 = vpop.f32.mrf.mxu0  ;;  %v812_v56 = vpop.f32.mrf.mxu1 }
 0x132   :  { %v724_v48 = vadd.f32 %v723_v54, %v397_v5  ;;  %v432_v5 = vpop.permute.xlu1 %431 }
 0x134   :  { %v813_v17 = vadd.f32 %v812_v56, %v724_v48  ;;  %762 = vmatmul.bf16.gmra.mxu0 %v1943_v42  ;;  %851 = vmatmul.bf16.gmra.mxu1 %v1947_v61  ;;  %v1974_v48 = vld [vmem:[%s3567_s4 + $0xc0] sm:$0xf] }
 0x136   :  { %v892_v43 = vmax.f32 %v813_v17, 0.0  ;;  %v2221_v17 = vld [vmem:[%s3567_s4 + $0xc4] sm:$0xf0] }
 0x137   :  { %v1975_v44 = vor.u32 %v2221_v17, %v1974_v48 }
 0x139   :  { %v725_v52 = vpop.f32.mrf.mxu0  ;;  %v814_v55 = vpop.f32.mrf.mxu1 }
 0x13a   :  { %v726_v25 = vadd.f32 %v725_v52, %v402_v53  ;;  %v2220_v53 = vld [vmem:[%s3567_s4 + $0xc4] sm:$0xf]  ;;  %v1976_v52 = vld [vmem:[%s3567_s4 + $0xc8] sm:$0xf0] }
 0x13b   :  { %v1979_v26 = vor.u32 %v2220_v53, %v1976_v52 }
 0x13c   :  { %v815_v20 = vadd.f32 %v814_v55, %v726_v25 }
 0x13e   :  { %v893_v41 = vmax.f32 %v815_v20, 0.0  ;;  %v437_v20 = vpop.permute.xlu2 %436 }
 0x140   :  { %v3051_v14 = vpack.c.bf16 %v893_v41, %v892_v43  ;;  %v3095_v41 = vpop.permute.xlu1 %446 }
 0x141   :  { %v728_v28 = vpop.f32.mrf.mxu0  ;;  %v817_v47 = vpop.f32.mrf.mxu1 }
 0x142   :  { %v729_v33 = vadd.f32 %v728_v28, %v407_v12 }
 0x144   :  { %v818_v2 = vadd.f32 %v817_v47, %v729_v33  ;;  %767 = vmatmul.bf16.gmra.mxu0 %v1951_v19  ;;  %856 = vmatmul.bf16.gmra.mxu1 %v1955_v27  ;;  %v1982_v33 = vld [vmem:[%s3567_s4 + $0xd0] sm:$0xf] }
 0x146   :  { %v894_v59 = vmax.f32 %v818_v2, 0.0  ;;  %v2223_v2 = vld [vmem:[%s3567_s4 + $0xd4] sm:$0xf0]  ;;  %v452_v36 = vpop.permute.xlu2 %451 }
 0x148   :  { %v462_v47 = vpop.permute.xlu1 %461 }
 0x149   :  { %v730_v34 = vpop.f32.mrf.mxu0  ;;  %v819_v8 = vpop.f32.mrf.mxu1 }
 0x14a   :  { %v731_v23 = vadd.f32 %v730_v34, %v412_v4  ;;  %v2222_v4 = vld [vmem:[%s3567_s4 + $0xd4] sm:$0xf]  ;;  %v1984_v34 = vld [vmem:[%s3567_s4 + $0xd8] sm:$0xf0] }
 0x14c   :  { %v820_v35 = vadd.f32 %v819_v8, %v731_v23  ;;  %v1983_v8 = vor.u32 %v2223_v2, %v1982_v33  ;;  %v1987_v23 = vor.u32 %v2222_v4, %v1984_v34 }
 0x14e   :  { %v895_v15 = vmax.f32 %v820_v35, 0.0 }
 0x150   :  { %v3065_v9 = vpack.c.bf16 %v895_v15, %v894_v59  ;;  %v477_v29 = vpop.permute.xlu1 %476 }
 0x151   :  { %v733_v62 = vpop.f32.mrf.mxu0  ;;  %v822_v31 = vpop.f32.mrf.mxu1 }
 0x152   :  { %v734_v40 = vadd.f32 %v733_v62, %v417_v38  ;;  %v457_v38 = vpop.permute.xlu0 %456  ;;  %v2224_v62 = vld [vmem:[%s3567_s4 + $0xe4] sm:$0xf] }
 0x154   :  { %v823_v51 = vadd.f32 %v822_v31, %v734_v40  ;;  %772 = vmatmul.bf16.gmra.mxu0 %v1959_v39  ;;  %861 = vmatmul.bf16.gmra.mxu1 %v1963_v7  ;;  %v1990_v39 = vld [vmem:[%s3567_s4 + $0xe0] sm:$0xf]  ;;  %v2225_v7 = vld [vmem:[%s3567_s4 + $0xe4] sm:$0xf0]  ;;  %v1992_v31 = vld [vmem:[%s3567_s4 + $0xe8] sm:$0xf0]  ;;  %v467_v40 = vpop.permute.xlu2 %466 }
 0x156   :  { %v896_v11 = vmax.f32 %v823_v51, 0.0 }
 0x158   :  { %v3127_v51 = vpop.permute.xlu1 %536 }
 0x159   :  { %v735_v60 = vpop.f32.mrf.mxu0  ;;  %v824_v10 = vpop.f32.mrf.mxu1 }
 0x15a   :  { %v736_v37 = vadd.f32 %v735_v60, %v422_v57  ;;  %v1991_v57 = vor.u32 %v2225_v7, %v1990_v39  ;;  %v1995_v60 = vor.u32 %v2224_v62, %v1992_v31 }
 0x15c   :  { %v825_v24 = vadd.f32 %v824_v10, %v736_v37  ;;  %v3129_v0 = vpop.permute.xlu2 %546 }
 0x15e   :  { %v897_v63 = vmax.f32 %v825_v24, 0.0  ;;  %v472_v24 = vpop.permute.xlu0 %471 }
 0x160   :  { %v3079_v30 = vpack.c.bf16 %v897_v63, %v896_v11  ;;  %v3131_v3 = vpop.permute.xlu1 %531  ;;  %v1998_v11 = vld [vmem:[%s3567_s4 + $0xf0] sm:$0xf]  ;;  %v2227_v63 = vld [vmem:[%s3567_s4 + $0xf4] sm:$0xf0] }
 0x161   :  { %v738_v22 = vpop.f32.mrf.mxu0  ;;  %v827_v50 = vpop.f32.mrf.mxu1 }
 0x162   :  { %v739_v21 = vadd.f32 %v738_v22, %v427_v58  ;;  %v2226_v58 = vld [vmem:[%s3567_s4 + $0xf4] sm:$0xf]  ;;  %v1999_v22 = vor.u32 %v2227_v63, %v1998_v11 }
 0x164   :  { %v828_v16 = vadd.f32 %v827_v50, %v739_v21  ;;  %777 = vmatmul.bf16.gmra.mxu0 %v1967_v13  ;;  %866 = vmatmul.bf16.gmra.mxu1 %v1971_v18  ;;  %v2000_v13 = vld [vmem:[%s3567_s4 + $0xf8] sm:$0xf0] }
 0x165   :  { %v2003_v50 = vor.u32 %v2226_v58, %v2000_v13 }
 0x166   :  { %v898_v55 = vmax.f32 %v828_v16, 0.0  ;;  %v3145_v18 = vpop.permute.xlu0 %551 }
 0x169   :  { %v740_v42 = vpop.f32.mrf.mxu0  ;;  %v829_v61 = vpop.f32.mrf.mxu1 }
 0x16a   :  { %v741_v54 = vadd.f32 %v740_v42, %v432_v5  ;;  %v3147_v5 = vpop.permute.xlu2 %541  ;;  %v3149_v42 = vpop.permute.xlu1 %506 }
 0x16c   :  { %v830_v56 = vadd.f32 %v829_v61, %v741_v54 }
 0x16e   :  { %v899_v25 = vmax.f32 %v830_v56, 0.0  ;;  %v3151_v17 = vpop.permute.xlu0 %526 }
 0x170   :  { %v3093_v46 = vpack.c.bf16 %v899_v25, %v898_v55 }
 0x171   :  { %v743_v6 = vpop.f32.mrf.mxu0  ;;  %v832_v43 = vpop.f32.mrf.mxu1 }
 0x172   :  { %v744_v12 = vadd.f32 %v743_v6, %v437_v20  ;;  %v3153_v25 = vpop.permute.xlu2 %516  ;;  %v3155_v6 = vpop.permute.xlu1 %501 }
 0x174   :  { %v3097_v19 = vadd.f32 %v832_v43, %v744_v12  ;;  %782 = vmatmul.bf16.gmra.mxu0 %v1975_v44  ;;  %871 = vmatmul.bf16.gmra.mxu1 %v1979_v26 }
 0x179   :  { %v3099_v27 = vpop.f32.mrf.mxu0  ;;  %v3101_v28 = vpop.f32.mrf.mxu1 }
 0x181   :  { %v748_v35 = vpop.f32.mrf.mxu0  ;;  %v837_v49 = vpop.f32.mrf.mxu1 }
 0x182   :  { %v749_v43 = vadd.f32 %v748_v35, %v3095_v41 }
 0x184   :  { %787 = vmatmul.bf16.gmra.mxu0 %v1983_v8  ;;  %876 = vmatmul.bf16.gmra.mxu1 %v1987_v23  ;;  %v838_v39 = vadd.f32 %v837_v49, %v749_v43  ;;  %v900_v49 = vmax.f32 %v3097_v19, 0.0 }
 0x189   :  { %v750_v59 = vpop.f32.mrf.mxu0  ;;  %v839_v15 = vpop.f32.mrf.mxu1 }
 0x18a   :  { %v751_v20 = vadd.f32 %v750_v59, %v452_v36  ;;  %v3159_v36 = vpop.permute.xlu0 %521 }
 0x18c   :  { %v840_v4 = vadd.f32 %v839_v15, %v751_v20 }
 0x18e   :  { %v903_v31 = vmax.f32 %v840_v4, 0.0 }
 0x191   :  { %v753_v10 = vpop.f32.mrf.mxu0  ;;  %v842_v37 = vpop.f32.mrf.mxu1 }
 0x192   :  { %v754_v53 = vadd.f32 %v753_v10, %v457_v38 }
 0x194   :  { %792 = vmatmul.bf16.gmra.mxu0 %v1991_v57  ;;  %881 = vmatmul.bf16.gmra.mxu1 %v1995_v60  ;;  %v843_v12 = vadd.f32 %v842_v37, %v754_v53  ;;  %v902_v57 = vmax.f32 %v838_v39, 0.0 }
 0x196   :  { %v904_v7 = vmax.f32 %v843_v12, 0.0  ;;  %v962_v15 = vpack.c.bf16 %v903_v31, %v902_v57  ;;  %v2086_v31 = vld [vmem:[%s3567_s4 + $0x120] sm:$0xf] }
 0x199   :  { %v755_v1 = vpop.f32.mrf.mxu0  ;;  %v844_v32 = vpop.f32.mrf.mxu1 }
 0x19a   :  { %v756_v54 = vadd.f32 %v755_v1, %v462_v47  ;;  %v746_v47 = vadd.f32 %v3099_v27, %v442_v45  ;;  %v482_v27 = vpop.permute.xlu1 %481  ;;  %v497_v1 = vpop.permute.xlu0 %496 }
 0x19c   :  { %v845_v44 = vadd.f32 %v844_v32, %v756_v54  ;;  %v835_v59 = vadd.f32 %v3101_v28, %v746_v47  ;;  %v2070_v54 = vld [vmem:[%s3567_s4 + $0x100] sm:$0xf] }
 0x19e   :  { %v905_v34 = vmax.f32 %v845_v44, 0.0  ;;  %v901_v45 = vmax.f32 %v835_v59, 0.0 }
 0x1a0   :  { %v963_v35 = vpack.c.bf16 %v905_v34, %v904_v7 }
 0x1a1   :  { %v758_v21 = vpop.f32.mrf.mxu0  ;;  %v847_v16 = vpop.f32.mrf.mxu1 }
 0x1a2   :  { %v759_v61 = vadd.f32 %v758_v21, %v467_v40  ;;  %v512_v40 = vpop.permute.xlu2 %511  ;;  %v492_v19 = vpop.permute.xlu0 %491 }
 0x1a4   :  { %797 = vmatmul.bf16.gmra.mxu0 %v1999_v22  ;;  %886 = vmatmul.bf16.gmra.mxu1 %v2003_v50  ;;  %v848_v52 = vadd.f32 %v847_v16, %v759_v61 }
 0x1a6   :  { %v906_v33 = vmax.f32 %v848_v52, 0.0 }
 0x1a9   :  { %v760_v56 = vpop.f32.mrf.mxu0  ;;  %v849_v48 = vpop.f32.mrf.mxu1 }
 0x1aa   :  { %v761_v55 = vadd.f32 %v760_v56, %v472_v24  ;;  %v961_v24 = vpack.c.bf16 %v901_v45, %v900_v49  ;;  %v487_v11 = vpop.permute.xlu2 %486  ;;  %v2229_v56 = vld [vmem:[%s3567_s4 + $0x104] sm:$0xf0] }
 0x1ab   :  { %v2071_v53 = vor.u32 %v2229_v56, %v2070_v54  ;;  %v2239_v54 = vld [vmem:[%s3567_s4 + $0x154] sm:$0xf0] }
 0x1ac   :  { %v850_v26 = vadd.f32 %v849_v48, %v761_v55 }
 0x1ae   :  { %v907_v2 = vmax.f32 %v850_v26, 0.0 }
 0x1b0   :  { %v964_v8 = vpack.c.bf16 %v907_v2, %v906_v33  ;;  %v2078_v33 = vld [vmem:[%s3567_s4 + $0x110] sm:$0xf]  ;;  %v2231_v2 = vld [vmem:[%s3567_s4 + $0x114] sm:$0xf0] }
 0x1b1   :  { %v763_v23 = vpop.f32.mrf.mxu0  ;;  %v852_v38 = vpop.f32.mrf.mxu1  ;;  %v2079_v47 = vor.u32 %v2231_v2, %v2078_v33 }
 0x1b2   :  { %v764_v62 = vadd.f32 %v763_v23, %v477_v29  ;;  %1326 = vmatpush.bf16.msra.mxu2 %v964_v8 }
 0x1b4   :  { %v853_v41 = vadd.f32 %v852_v38, %v764_v62 }
 0x1b6   :  { %1327 = vmatpush.bf16.msra.mxu2 %v963_v35  ;;  %v908_v32 = vmax.f32 %v853_v41, 0.0  ;;  %v2233_v41 = vld [vmem:[%s3567_s4 + $0x124] sm:$0xf0] }
 0x1b7   :  { %v2087_v57 = vor.u32 %v2233_v41, %v2086_v31 }
 0x1b9   :  { %v765_v60 = vpop.f32.mrf.mxu0  ;;  %v854_v10 = vpop.f32.mrf.mxu1 }
 0x1ba   :  { %v766_v37 = vadd.f32 %v765_v60, %v482_v27  ;;  %1328 = vmatpush.bf16.msra.mxu2 %v962_v15 }
 0x1bc   :  { %v855_v29 = vadd.f32 %v854_v10, %v766_v37 }
 0x1be   :  { %v909_v28 = vmax.f32 %v855_v29, 0.0  ;;  %1329 = vmatpush.bf16.msra.mxu2 %v961_v24  ;;  %v2094_v29 = vld [vmem:[%s3567_s4 + $0x130] sm:$0xf]  ;;  %v2235_v24 = vld [vmem:[%s3567_s4 + $0x134] sm:$0xf0] }
 0x1c0   :  { %v3163_v63 = vpack.c.bf16 %v909_v28, %v908_v32 }
 0x1c1   :  { %v768_v58 = vpop.f32.mrf.mxu0  ;;  %v857_v13 = vpop.f32.mrf.mxu1 }
 0x1c2   :  { %v769_v22 = vadd.f32 %v768_v58, %v487_v11  ;;  %1330 = vmatpush.bf16.msra.mxu2 %v3093_v46 }
 0x1c4   :  { %v858_v50 = vadd.f32 %v857_v13, %v769_v22  ;;  %v2237_v13 = vld [vmem:[%s3567_s4 + $0x144] sm:$0xf0] }
 0x1c6   :  { %1331 = vmatpush.bf16.msra.mxu2 %v3079_v30  ;;  %v910_v46 = vmax.f32 %v858_v50, 0.0 }
 0x1c9   :  { %v770_v21 = vpop.f32.mrf.mxu0  ;;  %v859_v16 = vpop.f32.mrf.mxu1 }
 0x1ca   :  { %v771_v61 = vadd.f32 %v770_v21, %v492_v19  ;;  %1332 = vmatpush.bf16.msra.mxu2 %v3065_v9 }
 0x1cc   :  { %v860_v48 = vadd.f32 %v859_v16, %v771_v61  ;;  %v2110_v61 = vld [vmem:[%s3567_s4 + $0x150] sm:$0xf] }
 0x1cd   :  { %v2111_v56 = vor.u32 %v2239_v54, %v2110_v61  ;;  %v2158_v61 = vld [vmem:[%s3567_s4 + $0x1b0] sm:$0xf]  ;;  %v2251_v54 = vld [vmem:[%s3567_s4 + $0x1b4] sm:$0xf0] }
 0x1ce   :  { %v911_v52 = vmax.f32 %v860_v48, 0.0  ;;  %1333 = vmatpush.bf16.msra.mxu2 %v3051_v14 }
 0x1d0   :  { %v3175_v30 = vpack.c.bf16 %v911_v52, %v910_v46 }
 0x1d1   :  { %v773_v55 = vpop.f32.mrf.mxu0  ;;  %v862_v20 = vpop.f32.mrf.mxu1  ;;  %1334 = vmatmul.bf16.vlgmr.msra.gmra.mxu2 %v2071_v53 }
 0x1d2   :  { %v774_v9 = vadd.f32 %v773_v55, %v497_v1  ;;  %v2095_v1 = vor.u32 %v2235_v24, %v2094_v29  ;;  %v2230_v29 = vld [vmem:[%s3567_s4 + $0x114] sm:$0xf] }
 0x1d4   :  { %v863_v44 = vadd.f32 %v862_v20, %v774_v9 }
 0x1d6   :  { %v912_v4 = vmax.f32 %v863_v44, 0.0 }
 0x1d9   :  { %v775_v26 = vpop.f32.mrf.mxu0  ;;  %v864_v43 = vpop.f32.mrf.mxu1 }
 0x1da   :  { %v776_v12 = vadd.f32 %v775_v26, %v3155_v6  ;;  %v2118_v26 = vld [vmem:[%s3567_s4 + $0x160] sm:$0xf] }
 0x1dc   :  { %v865_v14 = vadd.f32 %v864_v43, %v776_v12  ;;  %v2241_v43 = vld [vmem:[%s3567_s4 + $0x164] sm:$0xf0] }
 0x1de   :  { %v913_v34 = vmax.f32 %v865_v14, 0.0 }
 0x1e0   :  { %v3184_v8 = vpack.c.bf16 %v913_v34, %v912_v4 }
 0x1e1   :  { %v778_v23 = vpop.f32.mrf.mxu0  ;;  %v867_v38 = vpop.f32.mrf.mxu1  ;;  %1339 = vmatmul.bf16.gmra.mxu2 %v2079_v47 }
 0x1e2   :  { %v779_v39 = vadd.f32 %v778_v23, %v3149_v42 }
 0x1e4   :  { %v868_v6 = vadd.f32 %v867_v38, %v779_v39 }
 0x1e6   :  { %v914_v27 = vmax.f32 %v868_v6, 0.0 }
 0x1e9   :  { %v780_v7 = vpop.f32.mrf.mxu0  ;;  %v869_v62 = vpop.f32.mrf.mxu1 }
 0x1ea   :  { %v781_v59 = vadd.f32 %v780_v7, %v512_v40 }
 0x1ec   :  { %v870_v35 = vadd.f32 %v869_v62, %v781_v59 }
 0x1ee   :  { %v915_v45 = vmax.f32 %v870_v35, 0.0  ;;  %v2243_v35 = vld [vmem:[%s3567_s4 + $0x174] sm:$0xf0] }
 0x1f0   :  { %v3193_v15 = vpack.c.bf16 %v915_v45, %v914_v27  ;;  %v2134_v45 = vld [vmem:[%s3567_s4 + $0x180] sm:$0xf] }
 0x1f1   :  { %v783_v60 = vpop.f32.mrf.mxu0  ;;  %v872_v42 = vpop.f32.mrf.mxu1  ;;  %1344 = vmatmul.bf16.gmra.mxu2 %v2087_v57 }
 0x1f2   :  { %v784_v10 = vadd.f32 %v783_v60, %v3153_v25  ;;  %v2102_v25 = vld [vmem:[%s3567_s4 + $0x140] sm:$0xf]  ;;  %v2245_v60 = vld [vmem:[%s3567_s4 + $0x184] sm:$0xf0] }
 0x1f3   :  { %v2103_v22 = vor.u32 %v2237_v13, %v2102_v25  ;;  %v2088_v25 = vld [vmem:[%s3567_s4 + $0x128] sm:$0xf0] }
 0x1f4   :  { %v873_v40 = vadd.f32 %v872_v42, %v784_v10  ;;  %v2228_v42 = vld [vmem:[%s3567_s4 + $0x104] sm:$0xf]  ;;  %v2135_v10 = vor.u32 %v2245_v60, %v2134_v45  ;;  %v2257_v45 = vld [vmem:[%s3567_s4 + $0x1e4] sm:$0xf0] }
 0x1f5   :  { %v2240_v60 = vld [vmem:[%s3567_s4 + $0x164] sm:$0xf] }
 0x1f9   :  { %v785_v49 = vpop.f32.mrf.mxu0  ;;  %v874_v37 = vpop.f32.mrf.mxu1 }
 0x201   :  { %v788_v32 = vpop.f32.mrf.mxu0  ;;  %v877_v28 = vpop.f32.mrf.mxu1  ;;  %1349 = vmatmul.bf16.gmra.mxu2 %v2095_v1 }
 0x202   :  { %v789_v14 = vadd.f32 %v788_v32, %v3151_v17  ;;  %v916_v17 = vmax.f32 %v873_v40, 0.0  ;;  %v3248_v40 = vpop.permute.xlu0 %1013 }
 0x204   :  { %v878_v39 = vadd.f32 %v877_v28, %v789_v14  ;;  %v2150_v28 = vld [vmem:[%s3567_s4 + $0x1a0] sm:$0xf] }
 0x206   :  { %v918_v59 = vmax.f32 %v878_v39, 0.0 }
 0x209   :  { %v790_v11 = vpop.f32.mrf.mxu0  ;;  %v879_v58 = vpop.f32.mrf.mxu1 }
 0x20a   :  { %v791_v33 = vadd.f32 %v790_v11, %v3131_v3  ;;  %v2249_v11 = vld [vmem:[%s3567_s4 + $0x1a4] sm:$0xf0] }
 0x20c   :  { %v880_v34 = vadd.f32 %v879_v58, %v791_v33  ;;  %v2232_v58 = vld [vmem:[%s3567_s4 + $0x124] sm:$0xf] }
 0x20e   :  { %v919_v62 = vmax.f32 %v880_v34, 0.0 }
 0x210   :  { %v970_v41 = vpack.c.bf16 %v919_v62, %v918_v59  ;;  %v2112_v62 = vld [vmem:[%s3567_s4 + $0x158] sm:$0xf0] }
 0x211   :  { %v793_v50 = vpop.f32.mrf.mxu0  ;;  %v882_v19 = vpop.f32.mrf.mxu1  ;;  %1354 = vmatmul.bf16.gmra.mxu2 %v2103_v22  ;;  %v2151_v22 = vor.u32 %v2249_v11, %v2150_v28  ;;  %v2259_v11 = vld [vmem:[%s3567_s4 + $0x1f4] sm:$0xf0] }
 0x212   :  { %v794_v20 = vadd.f32 %v793_v50, %v3127_v51  ;;  %v2091_v50 = vor.u32 %v2232_v58, %v2088_v25  ;;  %v2242_v58 = vld [vmem:[%s3567_s4 + $0x174] sm:$0xf]  ;;  %v2128_v25 = vld [vmem:[%s3567_s4 + $0x178] sm:$0xf0] }
 0x214   :  { %v883_v51 = vadd.f32 %v882_v19, %v794_v20  ;;  %v3281_v19 = vpop.permute.xlu2 %1008 }
 0x216   :  { %v920_v6 = vmax.f32 %v883_v51, 0.0 }
 0x219   :  { %v795_v21 = vpop.f32.mrf.mxu0  ;;  %v884_v16 = vpop.f32.mrf.mxu1 }
 0x21a   :  { %v796_v52 = vadd.f32 %v795_v21, %v3147_v5  ;;  %v2119_v5 = vor.u32 %v2241_v43, %v2118_v26  ;;  %v3283_v21 = vpop.permute.xlu1 %1018 }
 0x221   :  { %v798_v48 = vpop.f32.mrf.mxu0  ;;  %v887_v53 = vpop.f32.mrf.mxu1  ;;  %1359 = vmatmul.bf16.gmra.mxu2 %v2111_v56  ;;  %v2234_v56 = vld [vmem:[%s3567_s4 + $0x134] sm:$0xf] }
 0x222   :  { %v799_v46 = vadd.f32 %v798_v48, %v3129_v0  ;;  %v885_v0 = vadd.f32 %v884_v16, %v796_v52  ;;  %v2096_v48 = vld [vmem:[%s3567_s4 + $0x138] sm:$0xf0]  ;;  %v2159_v52 = vor.u32 %v2251_v54, %v2158_v61  ;;  %v3303_v20 = vpop.permute.xlu1 %1033  ;;  %v2131_v61 = vor.u32 %v2242_v58, %v2128_v25 }
 0x224   :  { %v888_v9 = vadd.f32 %v887_v53, %v799_v46  ;;  %v921_v23 = vmax.f32 %v885_v0, 0.0  ;;  %v3301_v46 = vpop.permute.xlu2 %1023  ;;  %v2253_v0 = vld [vmem:[%s3567_s4 + $0x1c4] sm:$0xf0] }
 0x226   :  { %v922_v47 = vmax.f32 %v888_v9, 0.0  ;;  %v971_v3 = vpack.c.bf16 %v921_v23, %v920_v6  ;;  %v2255_v6 = vld [vmem:[%s3567_s4 + $0x1d4] sm:$0xf0] }
 0x229   :  { %v800_v55 = vpop.f32.mrf.mxu0  ;;  %v889_v12 = vpop.f32.mrf.mxu1 }
 0x22a   :  { %v801_v44 = vadd.f32 %v800_v55, %v3145_v18  ;;  %v786_v18 = vadd.f32 %v785_v49, %v3159_v36  ;;  %v2126_v36 = vld [vmem:[%s3567_s4 + $0x170] sm:$0xf]  ;;  %v2099_v55 = vor.u32 %v2234_v56, %v2096_v48  ;;  %v3311_v43 = vpop.permute.xlu1 %1048 }
 0x22b   :  { %v2127_v27 = vor.u32 %v2243_v35, %v2126_v36  ;;  %v2142_v49 = vld [vmem:[%s3567_s4 + $0x190] sm:$0xf] }
 0x22c   :  { %v890_v2 = vadd.f32 %v889_v12, %v801_v44  ;;  %v875_v7 = vadd.f32 %v874_v37, %v786_v18  ;;  %v2247_v37 = vld [vmem:[%s3567_s4 + $0x194] sm:$0xf0]  ;;  %v3309_v26 = vpop.permute.xlu2 %1038  ;;  %v2166_v12 = vld [vmem:[%s3567_s4 + $0x1c0] sm:$0xf] }
 0x22d   :  { %v2143_v24 = vor.u32 %v2247_v37, %v2142_v49  ;;  %v2167_v14 = vor.u32 %v2253_v0, %v2166_v12  ;;  %v2136_v12 = vld [vmem:[%s3567_s4 + $0x188] sm:$0xf0] }
 0x22e   :  { %v923_v4 = vmax.f32 %v890_v2, 0.0  ;;  %v917_v31 = vmax.f32 %v875_v7, 0.0  ;;  %v2236_v2 = vld [vmem:[%s3567_s4 + $0x144] sm:$0xf]  ;;  %v2238_v7 = vld [vmem:[%s3567_s4 + $0x154] sm:$0xf] }
 0x230   :  { %v972_v38 = vpack.c.bf16 %v923_v4, %v922_v47  ;;  %v969_v57 = vpack.c.bf16 %v917_v31, %v916_v17  ;;  %v2115_v31 = vor.u32 %v2238_v7, %v2112_v62 }
 0x231   :  { %1364 = vmatmul.bf16.gmra.mxu2 %v2119_v5  ;;  %v2104_v5 = vld [vmem:[%s3567_s4 + $0x148] sm:$0xf0] }
 0x232   :  { %1415 = vmatpush.bf16.msra.mxu3 %v972_v38  ;;  %v2107_v51 = vor.u32 %v2236_v2, %v2104_v5  ;;  %v3331_v18 = vpop.permute.xlu1 %1063  ;;  %v2174_v38 = vld [vmem:[%s3567_s4 + $0x1d0] sm:$0xf] }
 0x233   :  { %v2175_v59 = vor.u32 %v2255_v6, %v2174_v38 }
 0x234   :  { %v3329_v4 = vpop.permute.xlu2 %1053 }
 0x236   :  { %1416 = vmatpush.bf16.msra.mxu3 %v971_v3 }
 0x23a   :  { %1417 = vmatpush.bf16.msra.mxu3 %v970_v41  ;;  %v3351_v3 = vpop.permute.xlu1 %1078 }
 0x23c   :  { %v3340_v39 = vpop.permute.xlu2 %1068 }
 0x23e   :  { %1418 = vmatpush.bf16.msra.mxu3 %v969_v57 }
 0x241   :  { %1369 = vmatmul.bf16.gmra.mxu2 %v2127_v27  ;;  %v2182_v27 = vld [vmem:[%s3567_s4 + $0x1e0] sm:$0xf] }
 0x242   :  { %1419 = vmatpush.bf16.msra.mxu3 %v3193_v15  ;;  %v2072_v15 = vld [vmem:[%s3567_s4 + $0x108] sm:$0xf0]  ;;  %v3359_v35 = vpop.permute.xlu1 %1093 }
 0x244   :  { %v3357_v36 = vpop.permute.xlu2 %1083 }
 0x246   :  { %1420 = vmatpush.bf16.msra.mxu3 %v3184_v8  ;;  %v2075_v8 = vor.u32 %v2228_v42, %v2072_v15  ;;  %v2120_v42 = vld [vmem:[%s3567_s4 + $0x168] sm:$0xf0] }
 0x24a   :  { %1421 = vmatpush.bf16.msra.mxu3 %v3175_v30  ;;  %v3251_v30 = vpop.permute.xlu0 %1028  ;;  %v3379_v37 = vpop.permute.xlu1 %1108 }
 0x24c   :  { %v3377_v49 = vpop.permute.xlu2 %1098 }
 0x24e   :  { %1422 = vmatpush.bf16.msra.mxu3 %v3163_v63  ;;  %v2080_v63 = vld [vmem:[%s3567_s4 + $0x118] sm:$0xf0] }
 0x24f   :  { %v2083_v1 = vor.u32 %v2230_v29, %v2080_v63 }
 0x251   :  { %1374 = vmatmul.bf16.gmra.mxu2 %v2135_v10  ;;  %1423 = vmatmul.bf16.vlgmr.msra.gmra.mxu3 %v2075_v8  ;;  %v2183_v10 = vor.u32 %v2257_v45, %v2182_v27  ;;  %v2123_v8 = vor.u32 %v2240_v60, %v2120_v42  ;;  %v2246_v45 = vld [vmem:[%s3567_s4 + $0x194] sm:$0xf]  ;;  %v2144_v60 = vld [vmem:[%s3567_s4 + $0x198] sm:$0xf0] }
 0x252   :  { %v3265_v32 = vpop.permute.xlu0 %1043  ;;  %v3390_v28 = vpop.permute.xlu1 %1123 }
 0x254   :  { %v3299_v53 = vpop.f32.mrf.mxu2 }
 0x25a   :  { %v3279_v13 = vpop.permute.xlu0 %1058  ;;  %v3405_v48 = vpop.permute.xlu1 %1138 }
 0x25c   :  { %v3307_v44 = vpop.f32.mrf.mxu2 }
 0x261   :  { %1379 = vmatmul.bf16.gmra.mxu2 %v2143_v24  ;;  %1428 = vmatmul.bf16.gmra.mxu3 %v2083_v1  ;;  %v3385_v24 = vpop.permute.xlu2 %1113  ;;  %v2190_v1 = vld [vmem:[%s3567_s4 + $0x1f0] sm:$0xf] }
 0x262   :  { %v3285_v16 = vpop.permute.xlu0 %1073  ;;  %v3417_v5 = vpop.permute.xlu1 %1153 }
 0x264   :  { %v3327_v47 = vpop.f32.mrf.mxu2 }
 0x265   :  { %v1341_v25 = vadd.f32 %v3327_v47, %v3283_v21 }
 0x269   :  { %v3403_v56 = vpop.permute.xlu2 %1128 }
 0x26a   :  { %v3305_v9 = vpop.permute.xlu0 %1088 }
 0x26c   :  { %v3335_v23 = vpop.f32.mrf.mxu2 }
 0x271   :  { %1384 = vmatmul.bf16.gmra.mxu2 %v2151_v22  ;;  %1433 = vmatmul.bf16.gmra.mxu3 %v2091_v50  ;;  %v2191_v50 = vor.u32 %v2259_v11, %v2190_v1  ;;  %v3415_v0 = vpop.permute.xlu2 %1143 }
 0x272   :  { %v3316_v33 = vpop.permute.xlu0 %1103 }
 0x274   :  { %v3355_v17 = vpop.f32.mrf.mxu2 }
 0x279   :  { %v3423_v7 = vpop.permute.xlu2 %1158 }
 0x27a   :  { %v3333_v34 = vpop.permute.xlu0 %1118 }
 0x27c   :  { %v3375_v15 = vpop.f32.mrf.mxu2 }
 0x281   :  { %1389 = vmatmul.bf16.gmra.mxu2 %v2159_v52  ;;  %1438 = vmatmul.bf16.gmra.mxu3 %v2099_v55  ;;  %v2244_v55 = vld [vmem:[%s3567_s4 + $0x184] sm:$0xf]  ;;  %v1576_v1 = vpop.permute.xlu2 %1575 }
 0x282   :  { %v3353_v41 = vpop.permute.xlu0 %1133  ;;  %v2139_v2 = vor.u32 %v2244_v55, %v2136_v12 }
 0x284   :  { %v3383_v63 = vpop.f32.mrf.mxu2 }
 0x28a   :  { %v3361_v57 = vpop.permute.xlu0 %1148 }
 0x28c   :  { %v3401_v54 = vpop.f32.mrf.mxu2 }
 0x291   :  { %1394 = vmatmul.bf16.gmra.mxu2 %v2167_v14  ;;  %1443 = vmatmul.bf16.gmra.mxu3 %v2107_v51  ;;  %v1336_v51 = vadd.f32 %v3299_v53, %v3281_v19  ;;  %v1338_v19 = vadd.f32 %v3307_v44, %v3248_v40  ;;  %v2248_v40 = vld [vmem:[%s3567_s4 + $0x1a4] sm:$0xf]  ;;  %v2152_v44 = vld [vmem:[%s3567_s4 + $0x1a8] sm:$0xf0] }
 0x292   :  { %v3381_v29 = vpop.permute.xlu0 %1163 }
 0x294   :  { %v3435_v58 = vpop.f32.mrf.mxu2 }
 0x29a   :  { %v1581_v22 = vpop.permute.xlu0 %1580 }
 0x29c   :  { %v3449_v21 = vpop.f32.mrf.mxu2 }
 0x2a1   :  { %1399 = vmatmul.bf16.gmra.mxu2 %v2175_v59  ;;  %1448 = vmatmul.bf16.gmra.mxu3 %v2115_v31  ;;  %v1571_v59 = vpop.permute.xlu1 %1570 }
 0x2a2   :  { %v3407_v52 = vpop.permute.xlu0 %1595 }
 0x2aa   :  { %v3419_v14 = vpop.permute.xlu0 %1610 }
 0x2b1   :  { %1404 = vmatmul.bf16.gmra.mxu2 %v2183_v10  ;;  %1453 = vmatmul.bf16.gmra.mxu3 %v2123_v8  ;;  %v2147_v10 = vor.u32 %v2246_v45, %v2144_v60  ;;  %v1586_v45 = vpop.permute.xlu1 %1585 }
 0x2b2   :  { %v3425_v27 = vpop.permute.xlu0 %1625 }
 0x2c1   :  { %1409 = vmatmul.bf16.gmra.mxu2 %v2191_v50  ;;  %1458 = vmatmul.bf16.gmra.mxu3 %v2131_v61  ;;  %v3439_v61 = vpop.permute.xlu0 %1640 }
 0x2d1   :  { %1463 = vmatmul.bf16.gmra.mxu3 %v2139_v2 }
 0x2d4   :  { %v1424_v38 = vpop.f32.mrf.mxu3 }
 0x2d5   :  { %v1425_v6 = vadd.f32 %v1424_v38, %v1336_v51  ;;  %v1343_v38 = vadd.f32 %v3335_v23, %v3301_v46  ;;  %v2250_v23 = vld [vmem:[%s3567_s4 + $0x1b4] sm:$0xf] }
 0x2d7   :  { %v1504_v62 = vmax.f32 %v1425_v6, 0.0 }
 0x2d9   :  { %v1728_v31 = vmul.f32 %v1571_v59, %v1504_v62  ;;  %v2155_v59 = vor.u32 %v2248_v40, %v2152_v44 }
 0x2dc   :  { %v1426_v53 = vpop.f32.mrf.mxu3 }
 0x2dd   :  { %v1427_v42 = vadd.f32 %v1426_v53, %v1338_v19  ;;  %v1346_v19 = vadd.f32 %v3355_v17, %v3251_v30 }
 0x2df   :  { %v1505_v8 = vmax.f32 %v1427_v42, 0.0 }
 0x2e1   :  { %v1729_v11 = vmul.f32 %v1576_v1, %v1505_v8  ;;  %1468 = vmatmul.bf16.gmra.mxu3 %v2147_v10  ;;  %v3455_v8 = vpop.f32.mrf.mxu2  ;;  %v2160_v1 = vld [vmem:[%s3567_s4 + $0x1b8] sm:$0xf0] }
 0x2e3   :  { %v1760_v50 = vadd.f32 %v1729_v11, %v1728_v31  ;;  %v3451_v31 = vpop.permute.xlu0 %1655  ;;  %v1348_v11 = vadd.f32 %v3375_v15, %v3303_v20 }
 0x2e4   :  { %v1429_v55 = vpop.f32.mrf.mxu3 }
 0x2e5   :  { %v1430_v12 = vadd.f32 %v1429_v55, %v1341_v25 }
 0x2e7   :  { %v1506_v2 = vmax.f32 %v1430_v12, 0.0  ;;  %v1591_v12 = vpop.permute.xlu2 %1590 }
 0x2e9   :  { %v1730_v51 = vmul.f32 %v1581_v22, %v1506_v2  ;;  %v3467_v2 = vpop.f32.mrf.mxu2 }
 0x2eb   :  { %v1761_v6 = vadd.f32 %v1760_v50, %v1730_v51  ;;  %v3457_v46 = vpop.permute.xlu0 %1670  ;;  %v2163_v50 = vor.u32 %v2250_v23, %v2160_v1 }
 0x2ec   :  { %v1431_v47 = vpop.f32.mrf.mxu3 }
 0x2ed   :  { %v1432_v62 = vadd.f32 %v1431_v47, %v1343_v38  ;;  %v1351_v38 = vadd.f32 %v3383_v63, %v3309_v26  ;;  %v1353_v26 = vadd.f32 %v3401_v54, %v3265_v32 }
 0x2ef   :  { %v1507_v22 = vmax.f32 %v1432_v62, 0.0  ;;  %v1601_v62 = vpop.permute.xlu1 %1600 }
 0x2f1   :  { %v1731_v60 = vmul.f32 %v1586_v45, %v1507_v22  ;;  %1473 = vmatmul.bf16.gmra.mxu3 %v2155_v59  ;;  %v3474_v45 = vpop.f32.mrf.mxu2 }
 0x2f3   :  { %v1762_v53 = vadd.f32 %v1761_v6, %v1731_v60  ;;  %v3470_v44 = vpop.permute.xlu0 %1690  ;;  %v2252_v60 = vld [vmem:[%s3567_s4 + $0x1c4] sm:$0xf] }
 0x2f4   :  { %v1434_v42 = vpop.f32.mrf.mxu3 }
 0x2f5   :  { %v1435_v10 = vadd.f32 %v1434_v42, %v1346_v19  ;;  %v1763_v59 = vrot.slane %v1762_v53, 4 }
 0x2f7   :  { %v1508_v30 = vmax.f32 %v1435_v10, 0.0  ;;  %v1764_v42 = vadd.f32 %v1763_v59, %v1762_v53 }
 0x2f9   :  { %v1732_v51 = vmul.f32 %v1591_v12, %v1508_v30  ;;  %v1765_v30 = vrot.slane %v1764_v42, 2  ;;  %v1367_v12 = vpop.f32.mrf.mxu2 }
 0x2fb   :  { %v3484_v19 = vpop.permute.xlu0 %1715 }
 0x2fc   :  { %v1436_v25 = vpop.f32.mrf.mxu3 }
 0x2fd   :  { %v1437_v17 = vadd.f32 %v1436_v25, %v1348_v11  ;;  %v1606_v25 = vpop.permute.xlu2 %1605 }
 0x2ff   :  { %v1509_v55 = vmax.f32 %v1437_v17, 0.0 }
 0x301   :  { %v1733_v40 = vmul.f32 %v3407_v52, %v1509_v55  ;;  %1478 = vmatmul.bf16.gmra.mxu3 %v2163_v50  ;;  %v2168_v52 = vld [vmem:[%s3567_s4 + $0x1c8] sm:$0xf0]  ;;  %v1356_v50 = vadd.f32 %v3435_v58, %v3311_v43  ;;  %v1358_v43 = vadd.f32 %v3449_v21, %v3329_v4 }
 0x302   :  { %v2171_v1 = vor.u32 %v2252_v60, %v2168_v52 }
 0x303   :  { %v1769_v6 = vadd.f32 %v1733_v40, %v1732_v51  ;;  %v1766_v51 = vadd.f32 %v1765_v30, %v1764_v42  ;;  %v1361_v30 = vadd.f32 %v3455_v8, %v3279_v13 }
 0x304   :  { %v1439_v47 = vpop.f32.mrf.mxu3 }
 0x305   :  { %v1440_v20 = vadd.f32 %v1439_v47, %v1351_v38  ;;  %v3488_v38 = vpop.permute.xlu0 %1720 }
 0x307   :  { %v1510_v15 = vmax.f32 %v1440_v20, 0.0  ;;  %v2254_v20 = vld [vmem:[%s3567_s4 + $0x1d4] sm:$0xf] }
 0x309   :  { %v1734_v22 = vmul.f32 %v1601_v62, %v1510_v15  ;;  %v2176_v15 = vld [vmem:[%s3567_s4 + $0x1d8] sm:$0xf0] }
 0x30b   :  { %v1770_v63 = vadd.f32 %v1769_v6, %v1734_v22  ;;  %v1767_v6 = vrot.slane %v1766_v51, 1 }
 0x30c   :  { %v1441_v10 = vpop.f32.mrf.mxu3 }
 0x30d   :  { %v1442_v23 = vadd.f32 %v1441_v10, %v1353_v26  ;;  %v1768_v62 = vadd.f32 %v1767_v6, %v1766_v51  ;;  %v2179_v26 = vor.u32 %v2254_v20, %v2176_v15  ;;  %v2256_v6 = vld [vmem:[%s3567_s4 + $0x1e4] sm:$0xf] }
 0x30f   :  { %v1511_v11 = vmax.f32 %v1442_v23, 0.0  ;;  %v1616_v23 = vpop.permute.xlu1 %1615 }
 0x311   :  { %v1735_v17 = vmul.f32 %v1606_v25, %v1511_v11  ;;  %1483 = vmatmul.bf16.gmra.mxu3 %v2171_v1  ;;  %v3498_v1 = vpop.permute.xlu0 %1836 }
 0x312   :  { %v1839_v11 = vadd.f32 %v3498_v1, %v1768_v62 }
 0x313   :  { %v1771_v55 = vadd.f32 %v1770_v63, %v1735_v17  ;;  %v1370_v63 = vpop.f32.mrf.mxu2 }
 0x314   :  { %v1444_v40 = vpop.f32.mrf.mxu3 }
 0x315   :  { %v1772_v32 = vrot.slane %v1771_v55, 4  ;;  %v1445_v54 = vadd.f32 %v1444_v40, %v1356_v50 }
 0x317   :  { %v1773_v53 = vadd.f32 %v1772_v32, %v1771_v55  ;;  %v1512_v60 = vmax.f32 %v1445_v54, 0.0  ;;  %v1621_v32 = vpop.permute.xlu2 %1620 }
 0x319   :  { %v1774_v47 = vrot.slane %v1773_v53, 2  ;;  %v1736_v4 = vmul.f32 %v3419_v14, %v1512_v60  ;;  %v2184_v14 = vld [vmem:[%s3567_s4 + $0x1e8] sm:$0xf0] }
 0x31a   :  { %v2187_v15 = vor.u32 %v2256_v6, %v2184_v14  ;;  %v1371_v6 = vadd.f32 %v1370_v63, %v3351_v3 }
 0x31b   :  { %v1775_v58 = vadd.f32 %v1774_v47, %v1773_v53  ;;  %v1372_v54 = vpop.f32.mrf.mxu2  ;;  %v1363_v47 = vadd.f32 %v3467_v2, %v3331_v18  ;;  %v2258_v18 = vld [vmem:[%s3567_s4 + $0x1f4] sm:$0xf]  ;;  %v2192_v2 = vld [vmem:[%s3567_s4 + $0x1f8] sm:$0xf0] }
 0x31c   :  { %v1446_v59 = vpop.f32.mrf.mxu3 }
 0x31d   :  { %v1776_v22 = vrot.slane %v1775_v58, 1  ;;  %v1447_v52 = vadd.f32 %v1446_v59, %v1358_v43  ;;  %v1366_v59 = vadd.f32 %v3474_v45, %v3340_v39 }
 0x31f   :  { %v1777_v42 = vadd.f32 %v1776_v22, %v1775_v58  ;;  %v1513_v10 = vmax.f32 %v1447_v52, 0.0 }
 0x321   :  { %v1840_v25 = vadd.f32 %v3498_v1, %v1777_v42  ;;  %v1737_v21 = vmul.f32 %v1616_v23, %v1513_v10  ;;  %1488 = vmatmul.bf16.gmra.mxu3 %v2179_v26 }
 0x323   :  { %v1856_v17 = vsel %vm1855_vm0, %v1840_v25, %v1839_v11  ;;  %v1778_v50 = vadd.f32 %v1737_v21, %v1736_v4  ;;  %v1375_v62 = vpop.f32.mrf.mxu2  ;;  %v2195_v21 = vor.u32 %v2258_v18, %v2192_v2 }
 0x324   :  { %v1449_v55 = vpop.f32.mrf.mxu3 }
 0x325   :  { %v1450_v51 = vadd.f32 %v1449_v55, %v1361_v30  ;;  %v1636_v55 = vpop.permute.xlu2 %1635 }
 0x327   :  { %v1514_v40 = vmax.f32 %v1450_v51, 0.0  ;;  %v1631_v51 = vpop.permute.xlu1 %1630 }
 0x329   :  { %v1738_v53 = vmul.f32 %v1621_v32, %v1514_v40 }
 0x32b   :  { %v1779_v13 = vadd.f32 %v1778_v50, %v1738_v53  ;;  %v1377_v11 = vpop.f32.mrf.mxu2 }
 0x32c   :  { %v1451_v8 = vpop.f32.mrf.mxu3 }
 0x32d   :  { %v1452_v20 = vadd.f32 %v1451_v8, %v1363_v47 }
 0x32f   :  { %v1515_v43 = vmax.f32 %v1452_v20, 0.0 }
 0x331   :  { %v1739_v58 = vmul.f32 %v3425_v27, %v1515_v43  ;;  %1493 = vmatmul.bf16.gmra.mxu3 %v2187_v15  ;;  %v1368_v27 = vadd.f32 %v1367_v12, %v3285_v16  ;;  %v1373_v15 = vadd.f32 %v1372_v54, %v3357_v36 }
 0x333   :  { %v1780_v22 = vadd.f32 %v1779_v13, %v1739_v58  ;;  %v1380_v13 = vpop.f32.mrf.mxu2 }
 0x334   :  { %v1454_v60 = vpop.f32.mrf.mxu3 }
 0x335   :  { %v1781_v52 = vrot.slane %v1780_v22, 4  ;;  %v1455_v26 = vadd.f32 %v1454_v60, %v1366_v59  ;;  %v1646_v60 = vpop.permute.xlu1 %1645 }
 0x337   :  { %v1782_v42 = vadd.f32 %v1781_v52, %v1780_v22  ;;  %v1516_v45 = vmax.f32 %v1455_v26, 0.0 }
 0x339   :  { %v1783_v10 = vrot.slane %v1782_v42, 2  ;;  %v1740_v32 = vmul.f32 %v1631_v51, %v1516_v45 }
 0x33b   :  { %v1784_v23 = vadd.f32 %v1783_v10, %v1782_v42  ;;  %v1382_v52 = vpop.f32.mrf.mxu2  ;;  %v1376_v42 = vadd.f32 %v1375_v62, %v3305_v9 }
 0x33c   :  { %v1456_v25 = vpop.f32.mrf.mxu3 }
 0x33d   :  { %v1785_v39 = vrot.slane %v1784_v23, 1  ;;  %v1457_v4 = vadd.f32 %v1456_v25, %v1368_v27 }
 0x33f   :  { %v1786_v30 = vadd.f32 %v1785_v39, %v1784_v23  ;;  %v1517_v50 = vmax.f32 %v1457_v4, 0.0 }
 0x341   :  { %v1841_v40 = vadd.f32 %v3498_v1, %v1786_v30  ;;  %v1741_v53 = vmul.f32 %v1636_v55, %v1517_v50  ;;  %1498 = vmatmul.bf16.gmra.mxu3 %v2195_v21  ;;  %v1651_v21 = vpop.permute.xlu2 %1650  ;;  %v1381_v50 = vadd.f32 %v1380_v13, %v3377_v49 }
 0x343   :  { %v1858_v16 = vsel %vm1857_vm1, %v1841_v40, %v1856_v17  ;;  %v1787_v12 = vadd.f32 %v1741_v53, %v1740_v32  ;;  %v1385_v27 = vpop.f32.mrf.mxu2  ;;  %v1661_v53 = vpop.permute.xlu1 %1660 }
 0x344   :  { %v1459_v14 = vpop.f32.mrf.mxu3 }
 0x345   :  { %v1460_v47 = vadd.f32 %v1459_v14, %v1371_v6 }
 0x347   :  { %v1518_v8 = vmax.f32 %v1460_v47, 0.0 }
 0x349   :  { %v1742_v20 = vmul.f32 %v3439_v61, %v1518_v8  ;;  %v1378_v61 = vadd.f32 %v1377_v11, %v3359_v35 }
 0x34b   :  { %v1788_v43 = vadd.f32 %v1787_v12, %v1742_v20  ;;  %v1387_v40 = vpop.f32.mrf.mxu2  ;;  %v1383_v12 = vadd.f32 %v1382_v52, %v3316_v33 }
 0x34c   :  { %v1461_v58 = vpop.f32.mrf.mxu3 }
 0x34d   :  { %v1462_v59 = vadd.f32 %v1461_v58, %v1373_v15 }
 0x34f   :  { %v1519_v22 = vmax.f32 %v1462_v59, 0.0 }
 0x351   :  { %v1743_v26 = vmul.f32 %v1646_v60, %v1519_v22 }
 0x353   :  { %v1789_v3 = vadd.f32 %v1788_v43, %v1743_v26  ;;  %v1390_v20 = vpop.f32.mrf.mxu2  ;;  %v1666_v43 = vpop.permute.xlu2 %1665 }
 0x354   :  { %v1464_v63 = vpop.f32.mrf.mxu3 }
 0x355   :  { %v1790_v17 = vrot.slane %v1789_v3, 4  ;;  %v1465_v10 = vadd.f32 %v1464_v63, %v1376_v42  ;;  %v1388_v42 = vadd.f32 %v1387_v40, %v3385_v24 }
 0x357   :  { %v1791_v18 = vadd.f32 %v1790_v17, %v1789_v3  ;;  %v1520_v25 = vmax.f32 %v1465_v10, 0.0 }
 0x359   :  { %v1792_v2 = vrot.slane %v1791_v18, 2  ;;  %v1744_v62 = vmul.f32 %v1651_v21, %v1520_v25 }
 0x35b   :  { %v1793_v23 = vadd.f32 %v1792_v2, %v1791_v18  ;;  %v1392_v60 = vpop.f32.mrf.mxu2  ;;  %v1681_v33 = vpop.permute.xlu2 %1680 }
 0x35c   :  { %v1466_v36 = vpop.f32.mrf.mxu3 }
 0x35d   :  { %v1794_v54 = vrot.slane %v1793_v23, 1  ;;  %v1467_v39 = vadd.f32 %v1466_v36, %v1378_v61  ;;  %v1676_v61 = vpop.permute.xlu1 %1675 }
 0x35f   :  { %v1795_v45 = vadd.f32 %v1794_v54, %v1793_v23  ;;  %v1521_v4 = vmax.f32 %v1467_v39, 0.0  ;;  %v1391_v54 = vadd.f32 %v1390_v20, %v3333_v34 }
 0x361   :  { %v1842_v9 = vadd.f32 %v3498_v1, %v1795_v45  ;;  %v1745_v30 = vmul.f32 %v3451_v31, %v1521_v4  ;;  %v1386_v31 = vadd.f32 %v1385_v27, %v3379_v37 }
 0x363   :  { %v1860_v55 = vsel %vm1859_vm2, %v1842_v9, %v1858_v16  ;;  %v1796_v51 = vadd.f32 %v1745_v30, %v1744_v62  ;;  %v1395_v36 = vpop.f32.mrf.mxu2  ;;  %v3538_v4 = vpop.permute.xlu2 %1710  ;;  %v1393_v62 = vadd.f32 %v1392_v60, %v3390_v28 }
 0x364   :  { %v1469_v35 = vpop.f32.mrf.mxu3 }
 0x365   :  { %v1470_v11 = vadd.f32 %v1469_v35, %v1381_v50 }
 0x367   :  { %v1522_v32 = vmax.f32 %v1470_v11, 0.0 }
 0x369   :  { %v1746_v6 = vmul.f32 %v1661_v53, %v1522_v32 }
 0x36b   :  { %v1797_v14 = vadd.f32 %v1796_v51, %v1746_v6  ;;  %v1397_v50 = vpop.f32.mrf.mxu2 }
 0x36c   :  { %v1471_v47 = vpop.f32.mrf.mxu3 }
 0x36d   :  { %v1472_v8 = vadd.f32 %v1471_v47, %v1383_v12 }
 0x36f   :  { %v1523_v15 = vmax.f32 %v1472_v8, 0.0 }
 0x371   :  { %v1747_v58 = vmul.f32 %v1666_v43, %v1523_v15 }
 0x373   :  { %v1798_v49 = vadd.f32 %v1797_v14, %v1747_v58 }
 0x374   :  { %v1474_v16 = vpop.f32.mrf.mxu3 }
 0x375   :  { %v1799_v13 = vrot.slane %v1798_v49, 4  ;;  %v1475_v59 = vadd.f32 %v1474_v16, %v1386_v31  ;;  %v1696_v31 = vpop.permute.xlu1 %1695 }
 0x377   :  { %v1800_v22 = vadd.f32 %v1799_v13, %v1798_v49  ;;  %v1524_v17 = vmax.f32 %v1475_v59, 0.0  ;;  %v1398_v13 = vadd.f32 %v1397_v50, %v3353_v41  ;;  %v1396_v59 = vadd.f32 %v1395_v36, %v3403_v56 }
 0x379   :  { %v1801_v26 = vrot.slane %v1800_v22, 2  ;;  %v1748_v27 = vmul.f32 %v3457_v46, %v1524_v17  ;;  %v1686_v46 = vpop.permute.xlu2 %1685 }
 0x37b   :  { %v1802_v3 = vadd.f32 %v1801_v26, %v1800_v22 }
 0x37c   :  { %v1476_v52 = vpop.f32.mrf.mxu3 }
 0x37d   :  { %v1803_v63 = vrot.slane %v1802_v3, 1  ;;  %v1477_v10 = vadd.f32 %v1476_v52, %v1388_v42  ;;  %v1701_v26 = vpop.permute.xlu1 %1700 }
 0x37f   :  { %v1804_v18 = vadd.f32 %v1803_v63, %v1802_v3  ;;  %v1525_v2 = vmax.f32 %v1477_v10, 0.0 }
 0x381   :  { %v1843_v37 = vadd.f32 %v3498_v1, %v1804_v18  ;;  %v1749_v23 = vmul.f32 %v1676_v61, %v1525_v2 }
 0x383   :  { %v1862_v25 = vsel %vm1861_vm3, %v1843_v37, %v1860_v55  ;;  %v1805_v24 = vadd.f32 %v1749_v23, %v1748_v27  ;;  %v1400_v55 = vpop.f32.mrf.mxu2 }
 0x384   :  { %v1479_v39 = vpop.f32.mrf.mxu3  ;;  %v1401_v22 = vadd.f32 %v1400_v55, %v3405_v48 }
 0x385   :  { %v1480_v45 = vadd.f32 %v1479_v39, %v1391_v54  ;;  %v1706_v23 = vpop.permute.xlu1 %1705 }
 0x387   :  { %v1526_v21 = vmax.f32 %v1480_v45, 0.0 }
 0x389   :  { %v1750_v9 = vmul.f32 %v1681_v33, %v1526_v21 }
 0x38b   :  { %v1806_v30 = vadd.f32 %v1805_v24, %v1750_v9  ;;  %v1402_v15 = vpop.f32.mrf.mxu2 }
 0x38c   :  { %v1481_v51 = vpop.f32.mrf.mxu3  ;;  %v1403_v42 = vadd.f32 %v1402_v15, %v3415_v0 }
 0x38d   :  { %v1482_v40 = vadd.f32 %v1481_v51, %v1393_v62 }
 0x38f   :  { %v1527_v35 = vmax.f32 %v1482_v40, 0.0 }
 0x391   :  { %v1751_v11 = vmul.f32 %v1686_v46, %v1527_v35 }
 0x393   :  { %v1807_v32 = vadd.f32 %v1806_v30, %v1751_v11  ;;  %v1405_v49 = vpop.f32.mrf.mxu2 }
 0x394   :  { %v1484_v53 = vpop.f32.mrf.mxu3  ;;  %v1406_v39 = vadd.f32 %v1405_v49, %v3361_v57 }
 0x395   :  { %v1808_v34 = vrot.slane %v1807_v32, 4  ;;  %v1485_v33 = vadd.f32 %v1484_v53, %v1396_v59 }
 0x397   :  { %v1809_v6 = vadd.f32 %v1808_v34, %v1807_v32  ;;  %v1528_v18 = vmax.f32 %v1485_v33, 0.0 }
 0x399   :  { %v1810_v12 = vrot.slane %v1809_v6, 2  ;;  %v1752_v41 = vmul.f32 %v3470_v44, %v1528_v18 }
 0x39b   :  { %v1811_v14 = vadd.f32 %v1810_v12, %v1809_v6  ;;  %v1407_v3 = vpop.f32.mrf.mxu2  ;;  %v1726_v12 = vpop.permute.xlu2 %1725 }
 0x39c   :  { %v1486_v47 = vpop.f32.mrf.mxu3  ;;  %v1408_v0 = vadd.f32 %v1407_v3, %v3417_v5 }
 0x39d   :  { %v1812_v8 = vrot.slane %v1811_v14, 1  ;;  %v1487_v60 = vadd.f32 %v1486_v47, %v1398_v13 }
 0x39f   :  { %v1813_v20 = vadd.f32 %v1812_v8, %v1811_v14  ;;  %v1529_v17 = vmax.f32 %v1487_v60, 0.0 }
 0x3a1   :  { %v1844_v28 = vadd.f32 %v3498_v1, %v1813_v20  ;;  %v1753_v61 = vmul.f32 %v1696_v31, %v1529_v17 }
 0x3a3   :  { %v3542_v43 = vsel %vm1863_vm4, %v1844_v28, %v1862_v25  ;;  %v1410_v48 = vpop.f32.mrf.mxu2  ;;  %v1814_v36 = vadd.f32 %v1753_v61, %v1752_v41 }
 0x3a4   :  { %v1489_v58 = vpop.f32.mrf.mxu3  ;;  %v1411_v45 = vadd.f32 %v1410_v48, %v3423_v7 }
 0x3a5   :  { %v1490_v52 = vadd.f32 %v1489_v58, %v1401_v22 }
 0x3a7   :  { %v1530_v2 = vmax.f32 %v1490_v52, 0.0 }
 0x3a9   :  { %v1754_v27 = vmul.f32 %v1701_v26, %v1530_v2 }
 0x3ab   :  { %v1815_v25 = vadd.f32 %v1814_v36, %v1754_v27  ;;  %v1412_v51 = vpop.f32.mrf.mxu2 }
 0x3ac   :  { %v1491_v16 = vpop.f32.mrf.mxu3  ;;  %v1413_v11 = vadd.f32 %v1412_v51, %v3381_v29 }
 0x3ad   :  { %v1492_v10 = vadd.f32 %v1491_v16, %v1403_v42 }
 0x3af   :  { %v1531_v37 = vmax.f32 %v1492_v10, 0.0 }
 0x3b1   :  { %v1755_v54 = vmul.f32 %v1706_v23, %v1531_v37 }
 0x3b3   :  { %v1816_v24 = vadd.f32 %v1815_v25, %v1755_v54 }
 0x3b4   :  { %v1494_v63 = vpop.f32.mrf.mxu3 }
 0x3b5   :  { %v1495_v62 = vadd.f32 %v1494_v63, %v1406_v39  ;;  %v1817_v50 = vrot.slane %v1816_v24, 4 }
 0x3b7   :  { %v1532_v40 = vmax.f32 %v1495_v62, 0.0  ;;  %v1818_v46 = vadd.f32 %v1817_v50, %v1816_v24 }
 0x3b9   :  { %v1756_v53 = vmul.f32 %v3538_v4, %v1532_v40  ;;  %v1819_v34 = vrot.slane %v1818_v46, 2 }
 0x3bb   :  { %v1820_v8 = vadd.f32 %v1819_v34, %v1818_v46 }
 0x3bc   :  { %v1496_v56 = vpop.f32.mrf.mxu3 }
 0x3bd   :  { %v1497_v21 = vadd.f32 %v1496_v56, %v1408_v0  ;;  %v1821_v28 = vrot.slane %v1820_v8, 1 }
 0x3bf   :  { %v1533_v44 = vmax.f32 %v1497_v21, 0.0  ;;  %v1822_v31 = vadd.f32 %v1821_v28, %v1820_v8 }
 0x3c1   :  { %v1757_v32 = vmul.f32 %v3484_v19, %v1533_v44  ;;  %v1845_v4 = vadd.f32 %v3498_v1, %v1822_v31 }
 0x3c3   :  { %v1823_v55 = vadd.f32 %v1757_v32, %v1756_v53  ;;  %v1866_v13 = vsel %vm1865_vm5, %v1845_v4, %v3542_v43 }
 0x3c4   :  { %v1499_v9 = vpop.f32.mrf.mxu3 }
 0x3c5   :  { %v1500_v30 = vadd.f32 %v1499_v9, %v1411_v45 }
 0x3c7   :  { %v1534_v35 = vmax.f32 %v1500_v30, 0.0 }
 0x3c9   :  { %v1758_v57 = vmul.f32 %v3488_v38, %v1534_v35 }
 0x3cb   :  { %v1824_v14 = vadd.f32 %v1823_v55, %v1758_v57 }
 0x3cc   :  { %v1501_v5 = vpop.f32.mrf.mxu3 }
 0x3cd   :  { %v1502_v7 = vadd.f32 %v1501_v5, %v1413_v11 }
 0x3cf   :  { %v1535_v6 = vmax.f32 %v1502_v7, 0.0 }
 0x3d1   :  { %v1759_v47 = vmul.f32 %v1726_v12, %v1535_v6 }
 0x3d3   :  { %v1825_v20 = vadd.f32 %v1824_v14, %v1759_v47 }
 0x3d5   :  { %v1826_v15 = vrot.slane %v1825_v20, 4 }
 0x3d7   :  { %v1827_v58 = vadd.f32 %v1826_v15, %v1825_v20 }
 0x3d9   :  { %v1828_v29 = vrot.slane %v1827_v58, 2 }
 0x3db   :  { %v1829_v19 = vadd.f32 %v1828_v29, %v1827_v58 }
 0x3dd   :  { %v1830_v49 = vrot.slane %v1829_v19, 1 }
 0x3df   :  { %v1831_v38 = vadd.f32 %v1830_v49, %v1829_v19 }
 0x3e1   :  { %v1846_v16 = vadd.f32 %v3498_v1, %v1831_v38 }
 0x3e3   :  { %v1868_v59 = vsel %vm1867_vm6, %v1846_v16, %v1866_v13 }
 0x3e4   :  { %1870 = vst [vmem:[%s3570_s8] sm:$0xff] %v1868_v59 }

</bundles_post_ra>
